<compile_context>
chip_gen: v6e
topology: v6e:2x2x1
jax: 0.10.0
libtpu: 0.0.40
codegen_flags: <defaults>
</compile_context>

<pallas_src>
import functools

import jax
import jax.numpy as jnp
import numpy as np
from jax import lax
from jax.experimental import pallas as pl
from jax.experimental.pallas import tpu as pltpu


def _choose_t_tile(T, C):
    """Lane-aligned T tile targeting ~2 MiB f32 (1, C, T_TILE) input blocks.

    Never larger than the T extent (last block may still be partial when
    T % 128 != 0); for very short sequences use the full extent.
    """
    target_bytes = 2 << 20
    t_cap = max(128, (target_bytes // (4 * max(C, 1))) // 128 * 128)
    if T <= 128:
        return int(T)                         # exact (full-dim) block
    t_floor = (T // 128) * 128                # largest 128-multiple <= T
    return int(min(t_cap, t_floor))


def _stats_kernel(seq_ref, x_ref, sum_ref, sq_ref, *, t_tile):
    """Per-batch masked sum / sum-of-squares partials.

    seq_ref: (B,) int32 SMEM scalar prefetch (sequence lengths, clipped to T)
    x_ref:   (1, C, T_TILE) block of x
    sum_ref / sq_ref: (1, C, 1) float32 output blocks indexed by batch; they
        stay resident in VMEM across the t grid axis and act as accumulators.
    """
    b = pl.program_id(0)
    t = pl.program_id(1)

    @pl.when(t == 0)
    def _init():
        sum_ref[...] = jnp.zeros_like(sum_ref)
        sq_ref[...] = jnp.zeros_like(sq_ref)

    seq_b = seq_ref[b]
    t_idx = lax.broadcasted_iota(jnp.int32, (1, t_tile), 1) + t * t_tile
    valid = t_idx < seq_b                                        # (1, T_TILE)

    # Select (not multiply): garbage/NaN from the partial last block or from
    # ignored time steps never reaches the statistics.
    xw = jnp.where(valid, x_ref[0].astype(jnp.float32), 0.0)    # (C, T_TILE)
    sum_ref[0] = sum_ref[0] + jnp.sum(xw, axis=-1, keepdims=True)
    sq_ref[0] = sq_ref[0] + jnp.sum(xw * xw, axis=-1, keepdims=True)


def _normalize_kernel(seq_ref, x_ref, mean_ref, power_ref, gamma_ref, beta_ref,
                      y_ref, *, t_tile, eps):
    """y = where(t < seq_b, x * scale + bias, 0) for one (1, C, T_TILE) block."""
    b = pl.program_id(0)
    t = pl.program_id(1)
    seq_b = seq_ref[b]
    t_idx = lax.broadcasted_iota(jnp.int32, (1, 1, t_tile), 2) + t * t_tile

    # O(C) per step: fold normalization + affine into one per-channel FMA.
    # (Variance as E[x^2]-mean^2 matches the PyTorch reference; it is
    #  cancellation-prone if |mean| >> std.)
    mean = mean_ref[...].astype(jnp.float32)                     # (1, C, 1)
    power = power_ref[...].astype(jnp.float32)
    inv = lax.rsqrt(power - mean * mean + eps)                   # EUP slot
    scale = gamma_ref[...].astype(jnp.float32) * inv
    bias = beta_ref[...].astype(jnp.float32) - mean * scale

    x = x_ref[...].astype(jnp.float32)                           # (1, C, T_TILE)
    y = jnp.where(t_idx < seq_b, x * scale + bias, 0.0)
    y_ref[...] = y.astype(y_ref.dtype)


@functools.partial(jax.jit, static_argnames=("eps",))
def normalization_forward(x, seq_len, gamma, beta, *, eps=1e-5):
    """Pallas equivalent of `normalize(...)` (training-mode hot path of
    Normalization.forward) for data_format='bct', statistics_axis='bt',
    independent_axis='c', shift=True, scale=True.

    Returns (y, mean, power, n); mean/power/n are (1, C, 1) float32 and y has
    the dtype of x.
    """
    B, C, T = x.shape
    seq = jnp.clip(jnp.asarray(seq_len, jnp.int32).reshape(B), 0, T)

    t_tile = _choose_t_tile(T, C)
    n_t = pl.cdiv(T, t_tile)

    # ---- pass 1: per-batch masked partial sums (batch axis parallel) --------
    part_spec = pl.BlockSpec((1, C, 1), lambda b, t, s: (b, 0, 0))
    sums, sqs = pl.pallas_call(
        functools.partial(_stats_kernel, t_tile=t_tile),
        out_shape=(jax.ShapeDtypeStruct((B, C, 1), jnp.float32),
                   jax.ShapeDtypeStruct((B, C, 1), jnp.float32)),
        grid_spec=pltpu.PrefetchScalarGridSpec(
            num_scalar_prefetch=1,
            grid=(B, n_t),
            in_specs=[pl.BlockSpec((1, C, t_tile), lambda b, t, s: (b, 0, t))],
            out_specs=(part_spec, part_spec),
        ),
        compiler_params=pltpu.CompilerParams(
            dimension_semantics=("parallel", "arbitrary")),
    )(seq, x)

    # Exact valid-position count and the O(B*C) combine in plain JAX.
    n = jnp.sum(seq).astype(jnp.float32)
    inv_n = 1.0 / jnp.maximum(n, 1.0)
    mean3 = jnp.sum(sums, axis=0, keepdims=True) * inv_n        # (1, C, 1)
    power3 = jnp.sum(sqs, axis=0, keepdims=True) * inv_n        # (1, C, 1)
    n3 = jnp.full((1, C, 1), n, jnp.float32)

    # ---- pass 2: elementwise normalize + affine (both axes parallel) --------
    param_spec = pl.BlockSpec((1, C, 1), lambda b, t, s: (0, 0, 0))
    y = pl.pallas_call(
        functools.partial(_normalize_kernel, t_tile=t_tile, eps=float(eps)),
        out_shape=jax.ShapeDtypeStruct((B, C, T), x.dtype),
        grid_spec=pltpu.PrefetchScalarGridSpec(
            num_scalar_prefetch=1,
            grid=(B, n_t),
            in_specs=[pl.BlockSpec((1, C, t_tile), lambda b, t, s: (b, 0, t)),
                      param_spec, param_spec, param_spec, param_spec],
            out_specs=pl.BlockSpec((1, C, t_tile), lambda b, t, s: (b, 0, t)),
        ),
        compiler_params=pltpu.CompilerParams(
            dimension_semantics=("parallel", "parallel")),
    )(seq, x, mean3, power3,
      gamma.astype(jnp.float32), beta.astype(jnp.float32))

    return y, mean3, power3, n3


def update_running_stats(running_mean, running_power, num_tracked,
                         mean, power, n, *, momentum=0.5):
    """Plain-JAX glue mirroring Normalization._update_running_stats."""
    num_tracked = num_tracked + n
    new_mean = momentum * running_mean + (1.0 - momentum) * mean
    new_power = momentum * running_power + (1.0 - momentum) * power
    return new_mean, new_power, num_tracked


def _reference(x, seq_len, gamma, beta, eps=1e-5):
    """Pure-JAX reference of the PyTorch forward for verification."""
    B, C, T = x.shape
    t_idx = jnp.arange(T)[None, None, :]
    mask = (t_idx < jnp.asarray(seq_len)[:, None, None]).astype(x.dtype)
    mask = jnp.broadcast_to(mask, x.shape)
    n = mask.sum(axis=(0, 2), keepdims=True)
    xm = x * mask
    mean = xm.sum(axis=(0, 2), keepdims=True) / jnp.maximum(n, 1.0)
    power = (xm ** 2).sum(axis=(0, 2), keepdims=True) / jnp.maximum(n, 1.0)
    y = xm - mean
    y = y / jnp.sqrt(power - mean ** 2 + eps)
    y = y * gamma + beta
    return y * mask, mean, power, n


if __name__ == "__main__":
    key = jax.random.PRNGKey(0)
    B, C, T = 3, 10, 1000                    # 'bct' layout (C matches the doctest)
    kx, kg, kb = jax.random.split(key, 3)
    x = jax.random.normal(kx, (B, C, T), dtype=jnp.float32)
    seq_len = jnp.array([250, 617, 1000], dtype=jnp.int32)

    # Parameters as in Normalization.__init__ (independent_axis='c', shift/scale=True)
    gamma = 1.0 + 0.1 * jax.random.normal(kg, (1, C, 1), dtype=jnp.float32)
    beta = 0.1 * jax.random.normal(kb, (1, C, 1), dtype=jnp.float32)

    # Running-stat buffers as in __init__ (track_running_stats since 'b' in statistics_axis)
    running_mean = jnp.zeros((1, C, 1), jnp.float32)
    running_power = jnp.ones((1, C, 1), jnp.float32)
    num_tracked = jnp.zeros((1, C, 1), jnp.float32)

    y, mean, power, n = normalization_forward(x, seq_len, gamma, beta, eps=1e-5)
    running_mean, running_power, num_tracked = update_running_stats(
        running_mean, running_power, num_tracked, mean, power, n, momentum=0.5)

    jax.block_until_ready((y, mean, power, n,
                           running_mean, running_power, num_tracked))

    # correctness check against a pure-JAX reference of the PyTorch math
    y_ref, mean_ref, power_ref, n_ref = _reference(x, seq_len, gamma, beta, eps=1e-5)
    np.testing.assert_allclose(np.asarray(y), np.asarray(y_ref), rtol=1e-5, atol=1e-5)
    np.testing.assert_allclose(np.asarray(mean), np.asarray(mean_ref), rtol=1e-5, atol=1e-6)
    np.testing.assert_allclose(np.asarray(power), np.asarray(power_ref), rtol=1e-5, atol=1e-6)
    np.testing.assert_allclose(np.asarray(n), np.asarray(n_ref), rtol=0, atol=0)

    print("KERNEL_OK")
</pallas_src>

<mosaic_0001>
module attributes {stable_mosaic.version = 11 : i64} {
  func.func @_stats_kernel(%arg0: i32, %arg1: i32, %arg2: memref<3xi32, #tpu.memory_space<smem>>, %arg3: memref<1x10x896xf32, #tpu.memory_space<vmem>>, %arg4: memref<1x10x1xf32, #tpu.memory_space<vmem>>, %arg5: memref<1x10x1xf32, #tpu.memory_space<vmem>>) attributes {dimension_semantics = [#tpu.dimension_semantics<parallel>, #tpu.dimension_semantics<arbitrary>], iteration_bounds = array<i64: 3, 2>, scalar_prefetch = 1 : i64, scratch_operands = 0 : i64, tpu.core_type = #tpu.core_type<tc>, window_params = [{transform_indices = @transform_0, window_bounds = array<i64: 1, 10, 896>}, {transform_indices = @transform_1, window_bounds = array<i64: 1, 10, 1>}, {transform_indices = @transform_2, window_bounds = array<i64: 1, 10, 1>}]} {
    %c0_i32 = arith.constant 0 : i32
    %0 = arith.cmpi eq, %arg1, %c0_i32 : i32
    %1 = arith.extui %0 : i1 to i32
    %c0_i32_0 = arith.constant 0 : i32
    %2 = arith.cmpi ne, %1, %c0_i32_0 : i32
    scf.if %2 {
      %cst_17 = arith.constant 0.000000e+00 : f32
      %34 = vector.broadcast %cst_17 : f32 to vector<1x10x1xf32>
      %c0_18 = arith.constant 0 : index
      %c0_19 = arith.constant 0 : index
      %c0_20 = arith.constant 0 : index
      %35 = vector.load %arg4[%c0_18, %c0_19, %c0_20] : memref<1x10x1xf32, #tpu.memory_space<vmem>>, vector<1x10x1xf32>
      tpu.vector_store %arg4[%c0_18, %c0_19, %c0_20], %34 {strides = array<i32>} : memref<1x10x1xf32, #tpu.memory_space<vmem>>, vector<1x10x1xf32>,
      %cst_21 = arith.constant 0.000000e+00 : f32
      %36 = vector.broadcast %cst_21 : f32 to vector<1x10x1xf32>
      %c0_22 = arith.constant 0 : index
      %c0_23 = arith.constant 0 : index
      %c0_24 = arith.constant 0 : index
      %37 = vector.load %arg5[%c0_22, %c0_23, %c0_24] : memref<1x10x1xf32, #tpu.memory_space<vmem>>, vector<1x10x1xf32>
      tpu.vector_store %arg5[%c0_22, %c0_23, %c0_24], %36 {strides = array<i32>} : memref<1x10x1xf32, #tpu.memory_space<vmem>>, vector<1x10x1xf32>,
    } else {
    }
    %3 = arith.index_cast %arg0 : i32 to index
    %4 = memref.load %arg2[%3] : memref<3xi32, #tpu.memory_space<smem>>
    %5 = tpu.iota {dimensions = array<i32: 1>} : vector<1x896xi32>
    %c896_i32 = arith.constant 896 : i32
    %6 = arith.muli %arg1, %c896_i32 : i32
    %7 = vector.broadcast %6 : i32 to vector<1x896xi32>
    %8 = arith.addi %5, %7 : vector<1x896xi32>
    %9 = vector.broadcast %4 : i32 to vector<1x896xi32>
    %10 = arith.cmpi slt, %8, %9 : vector<1x896xi32>
    %c0 = arith.constant 0 : index
    %c0_1 = arith.constant 0 : index
    %c0_2 = arith.constant 0 : index
    %11 = vector.load %arg3[%c0, %c0_1, %c0_2] : memref<1x10x896xf32, #tpu.memory_space<vmem>>, vector<1x10x896xf32>
    %12 = vector.shape_cast %11 : vector<1x10x896xf32> to vector<10x896xf32>
    %cst = arith.constant 0.000000e+00 : f32
    %13 = vector.shape_cast %10 : vector<1x896xi1> to vector<1x896xi1>
    %14 = vector.broadcast %13 : vector<1x896xi1> to vector<10x896xi1>
    %15 = vector.broadcast %cst : f32 to vector<10x896xf32>
    %16 = arith.select %14, %12, %15 : vector<10x896xi1>, vector<10x896xf32>
    %c0_3 = arith.constant 0 : index
    %c0_4 = arith.constant 0 : index
    %c0_5 = arith.constant 0 : index
    %17 = vector.load %arg4[%c0_3, %c0_4, %c0_5] : memref<1x10x1xf32, #tpu.memory_space<vmem>>, vector<1x10x1xf32>
    %18 = vector.shape_cast %17 : vector<1x10x1xf32> to vector<10x1xf32>
    %cst_6 = arith.constant dense<0.000000e+00> : vector<10xf32>
    %19 = vector.multi_reduction <add>, %16, %cst_6 [1] : vector<10x896xf32> to vector<10xf32>
    %20 = vector.shape_cast %19 : vector<10xf32> to vector<10x1xf32>
    %21 = arith.addf %18, %20 : vector<10x1xf32>
    %c0_7 = arith.constant 0 : index
    %c0_8 = arith.constant 0 : index
    %c0_9 = arith.constant 0 : index
    %22 = vector.load %arg4[%c0_7, %c0_8, %c0_9] : memref<1x10x1xf32, #tpu.memory_space<vmem>>, vector<1x10x1xf32>
    %23 = vector.shape_cast %22 : vector<1x10x1xf32> to vector<10x1xf32>
    %24 = vector.shape_cast %21 : vector<10x1xf32> to vector<1x10x1xf32>
    tpu.vector_store %arg4[%c0_7, %c0_8, %c0_9], %24 {strides = array<i32>} : memref<1x10x1xf32, #tpu.memory_space<vmem>>, vector<1x10x1xf32>,
    %c0_10 = arith.constant 0 : index
    %c0_11 = arith.constant 0 : index
    %c0_12 = arith.constant 0 : index
    %25 = vector.load %arg5[%c0_10, %c0_11, %c0_12] : memref<1x10x1xf32, #tpu.memory_space<vmem>>, vector<1x10x1xf32>
    %26 = vector.shape_cast %25 : vector<1x10x1xf32> to vector<10x1xf32>
    %27 = arith.mulf %16, %16 : vector<10x896xf32>
    %cst_13 = arith.constant dense<0.000000e+00> : vector<10xf32>
    %28 = vector.multi_reduction <add>, %27, %cst_13 [1] : vector<10x896xf32> to vector<10xf32>
    %29 = vector.shape_cast %28 : vector<10xf32> to vector<10x1xf32>
    %30 = arith.addf %26, %29 : vector<10x1xf32>
    %c0_14 = arith.constant 0 : index
    %c0_15 = arith.constant 0 : index
    %c0_16 = arith.constant 0 : index
    %31 = vector.load %arg5[%c0_14, %c0_15, %c0_16] : memref<1x10x1xf32, #tpu.memory_space<vmem>>, vector<1x10x1xf32>
    %32 = vector.shape_cast %31 : vector<1x10x1xf32> to vector<10x1xf32>
    %33 = vector.shape_cast %30 : vector<10x1xf32> to vector<1x10x1xf32>
    tpu.vector_store %arg5[%c0_14, %c0_15, %c0_16], %33 {strides = array<i32>} : memref<1x10x1xf32, #tpu.memory_space<vmem>>, vector<1x10x1xf32>,
    return
  }
  func.func @transform_0(%arg0: i32, %arg1: i32, %arg2: memref<3xi32, #tpu.memory_space<smem>>) -> (i32, i32, i32) {
    %c0_i32 = arith.constant 0 : i32
    %c0_i32_0 = arith.constant 0 : i32
    return %arg0, %c0_i32, %arg1 : i32, i32, i32
  }
  func.func @transform_1(%arg0: i32, %arg1: i32, %arg2: memref<3xi32, #tpu.memory_space<smem>>) -> (i32, i32, i32) {
    %c0_i32 = arith.constant 0 : i32
    %c0_i32_0 = arith.constant 0 : i32
    %c0_i32_1 = arith.constant 0 : i32
    return %arg0, %c0_i32, %c0_i32_0 : i32, i32, i32
  }
  func.func @transform_2(%arg0: i32, %arg1: i32, %arg2: memref<3xi32, #tpu.memory_space<smem>>) -> (i32, i32, i32) {
    %c0_i32 = arith.constant 0 : i32
    %c0_i32_0 = arith.constant 0 : i32
    %c0_i32_1 = arith.constant 0 : i32
    return %arg0, %c0_i32, %c0_i32_0 : i32, i32, i32
  }
}

module attributes {stable_mosaic.version = 11 : i64} {
  func.func @_normalize_kernel(%arg0: i32, %arg1: i32, %arg2: memref<3xi32, #tpu.memory_space<smem>>, %arg3: memref<1x10x896xf32, #tpu.memory_space<vmem>>, %arg4: memref<1x10x1xf32, #tpu.memory_space<vmem>>, %arg5: memref<1x10x1xf32, #tpu.memory_space<vmem>>, %arg6: memref<1x10x1xf32, #tpu.memory_space<vmem>>, %arg7: memref<1x10x1xf32, #tpu.memory_space<vmem>>, %arg8: memref<1x10x896xf32, #tpu.memory_space<vmem>>) attributes {dimension_semantics = [#tpu.dimension_semantics<parallel>, #tpu.dimension_semantics<parallel>], iteration_bounds = array<i64: 3, 2>, scalar_prefetch = 1 : i64, scratch_operands = 0 : i64, tpu.core_type = #tpu.core_type<tc>, window_params = [{transform_indices = @transform_0, window_bounds = array<i64: 1, 10, 896>}, {pipeline_mode = #tpu.pipeline_mode<synchronous>, transform_indices = @transform_1, window_bounds = array<i64: 1, 10, 1>}, {pipeline_mode = #tpu.pipeline_mode<synchronous>, transform_indices = @transform_2, window_bounds = array<i64: 1, 10, 1>}, {pipeline_mode = #tpu.pipeline_mode<synchronous>, transform_indices = @transform_3, window_bounds = array<i64: 1, 10, 1>}, {pipeline_mode = #tpu.pipeline_mode<synchronous>, transform_indices = @transform_4, window_bounds = array<i64: 1, 10, 1>}, {transform_indices = @transform_5, window_bounds = array<i64: 1, 10, 896>}]} {
    %0 = arith.index_cast %arg0 : i32 to index
    %1 = memref.load %arg2[%0] : memref<3xi32, #tpu.memory_space<smem>>
    %2 = tpu.iota {dimensions = array<i32: 2>} : vector<1x1x896xi32>
    %c896_i32 = arith.constant 896 : i32
    %3 = arith.muli %arg1, %c896_i32 : i32
    %4 = vector.broadcast %3 : i32 to vector<1x1x896xi32>
    %5 = arith.addi %2, %4 : vector<1x1x896xi32>
    %c0 = arith.constant 0 : index
    %c0_0 = arith.constant 0 : index
    %c0_1 = arith.constant 0 : index
    %6 = vector.load %arg4[%c0, %c0_0, %c0_1] : memref<1x10x1xf32, #tpu.memory_space<vmem>>, vector<1x10x1xf32>
    %c0_2 = arith.constant 0 : index
    %c0_3 = arith.constant 0 : index
    %c0_4 = arith.constant 0 : index
    %7 = vector.load %arg5[%c0_2, %c0_3, %c0_4] : memref<1x10x1xf32, #tpu.memory_space<vmem>>, vector<1x10x1xf32>
    %8 = arith.mulf %6, %6 : vector<1x10x1xf32>
    %9 = arith.subf %7, %8 : vector<1x10x1xf32>
    %cst = arith.constant 9.99999974E-6 : f32
    %10 = vector.broadcast %cst : f32 to vector<1x10x1xf32>
    %11 = arith.addf %9, %10 : vector<1x10x1xf32>
    %12 = math.rsqrt %11 : vector<1x10x1xf32>
    %c0_5 = arith.constant 0 : index
    %c0_6 = arith.constant 0 : index
    %c0_7 = arith.constant 0 : index
    %13 = vector.load %arg6[%c0_5, %c0_6, %c0_7] : memref<1x10x1xf32, #tpu.memory_space<vmem>>, vector<1x10x1xf32>
    %14 = arith.mulf %13, %12 : vector<1x10x1xf32>
    %c0_8 = arith.constant 0 : index
    %c0_9 = arith.constant 0 : index
    %c0_10 = arith.constant 0 : index
    %15 = vector.load %arg7[%c0_8, %c0_9, %c0_10] : memref<1x10x1xf32, #tpu.memory_space<vmem>>, vector<1x10x1xf32>
    %16 = arith.mulf %6, %14 : vector<1x10x1xf32>
    %17 = arith.subf %15, %16 : vector<1x10x1xf32>
    %c0_11 = arith.constant 0 : index
    %c0_12 = arith.constant 0 : index
    %c0_13 = arith.constant 0 : index
    %18 = vector.load %arg3[%c0_11, %c0_12, %c0_13] : memref<1x10x896xf32, #tpu.memory_space<vmem>>, vector<1x10x896xf32>
    %19 = vector.broadcast %1 : i32 to vector<1x1x896xi32>
    %20 = arith.cmpi slt, %5, %19 : vector<1x1x896xi32>
    %21 = vector.broadcast %14 : vector<1x10x1xf32> to vector<1x10x896xf32>
    %22 = arith.mulf %18, %21 : vector<1x10x896xf32>
    %23 = vector.broadcast %17 : vector<1x10x1xf32> to vector<1x10x896xf32>
    %24 = arith.addf %22, %23 : vector<1x10x896xf32>
    %cst_14 = arith.constant 0.000000e+00 : f32
    %25 = vector.shape_cast %20 : vector<1x1x896xi1> to vector<1x1x896xi1>
    %26 = vector.broadcast %25 : vector<1x1x896xi1> to vector<1x10x896xi1>
    %27 = vector.broadcast %cst_14 : f32 to vector<1x10x896xf32>
    %28 = arith.select %26, %24, %27 : vector<1x10x896xi1>, vector<1x10x896xf32>
    %c0_15 = arith.constant 0 : index
    %c0_16 = arith.constant 0 : index
    %c0_17 = arith.constant 0 : index
    %29 = vector.load %arg8[%c0_15, %c0_16, %c0_17] : memref<1x10x896xf32, #tpu.memory_space<vmem>>, vector<1x10x896xf32>
    tpu.vector_store %arg8[%c0_15, %c0_16, %c0_17], %28 {strides = array<i32>} : memref<1x10x896xf32, #tpu.memory_space<vmem>>, vector<1x10x896xf32>,
    return
  }
  func.func @transform_0(%arg0: i32, %arg1: i32, %arg2: memref<3xi32, #tpu.memory_space<smem>>) -> (i32, i32, i32) {
    %c0_i32 = arith.constant 0 : i32
    %c0_i32_0 = arith.constant 0 : i32
    return %arg0, %c0_i32, %arg1 : i32, i32, i32
  }
  func.func @transform_1(%arg0: i32, %arg1: i32, %arg2: memref<3xi32, #tpu.memory_space<smem>>) -> (i32, i32, i32) {
    %c0_i32 = arith.constant 0 : i32
    %c0_i32_0 = arith.constant 0 : i32
    %c0_i32_1 = arith.constant 0 : i32
    %c0_i32_2 = arith.constant 0 : i32
    return %c0_i32, %c0_i32_0, %c0_i32_1 : i32, i32, i32
  }
  func.func @transform_2(%arg0: i32, %arg1: i32, %arg2: memref<3xi32, #tpu.memory_space<smem>>) -> (i32, i32, i32) {
    %c0_i32 = arith.constant 0 : i32
    %c0_i32_0 = arith.constant 0 : i32
    %c0_i32_1 = arith.constant 0 : i32
    %c0_i32_2 = arith.constant 0 : i32
    return %c0_i32, %c0_i32_0, %c0_i32_1 : i32, i32, i32
  }
  func.func @transform_3(%arg0: i32, %arg1: i32, %arg2: memref<3xi32, #tpu.memory_space<smem>>) -> (i32, i32, i32) {
    %c0_i32 = arith.constant 0 : i32
    %c0_i32_0 = arith.constant 0 : i32
    %c0_i32_1 = arith.constant 0 : i32
    %c0_i32_2 = arith.constant 0 : i32
    return %c0_i32, %c0_i32_0, %c0_i32_1 : i32, i32, i32
  }
  func.func @transform_4(%arg0: i32, %arg1: i32, %arg2: memref<3xi32, #tpu.memory_space<smem>>) -> (i32, i32, i32) {
    %c0_i32 = arith.constant 0 : i32
    %c0_i32_0 = arith.constant 0 : i32
    %c0_i32_1 = arith.constant 0 : i32
    %c0_i32_2 = arith.constant 0 : i32
    return %c0_i32, %c0_i32_0, %c0_i32_1 : i32, i32, i32
  }
  func.func @transform_5(%arg0: i32, %arg1: i32, %arg2: memref<3xi32, #tpu.memory_space<smem>>) -> (i32, i32, i32) {
    %c0_i32 = arith.constant 0 : i32
    %c0_i32_0 = arith.constant 0 : i32
    return %arg0, %c0_i32, %arg1 : i32, i32, i32
  }
}

</mosaic_0001>

<bundles_post_ra>
// kernel: normalization_forward.2
= control target key start
LH: loop header
LB: loop body
LE: loop exit
PB: predicated region body
PF: predicated region fallthrough
CT: control target
= control target key end

     0   :  { %s1588_s0 = inlined_call_operand.vmem [shape: s32[3], index: 0, kind: input, shape index: {}]   ;;  %s1589_s1 = inlined_call_operand.vmem [shape: f32[3,10,1000], index: 1, kind: input, shape index: {}]   ;;  %s1590_s2 = inlined_call_operand.vmem [shape: f32[3,10,1], index: 2, kind: output, shape index: {0}]   ;;  %s1591_s3 = inlined_call_operand.vmem [shape: f32[3,10,1], index: 3, kind: output, shape index: {1}]  }
   0x1   :  { %s9_s14 = sshll.u32 %s1588_s0, 4  ;;  %s10_s14 = int_to_ptr.vmem [resolvable:$true] %s9_s14 }
   0x2   :  { %s1183_s15 = scalar_lea.vmem %s10_s14, 16  ;;  %p1188_p1 = scmp.lt.s32.totalorder %s10_s14, %s10_s14 }
   0x3   :  { %p1184_p0 = scmp.ne.s32.totalorder %s10_s14, %s1183_s15  ;;  %p1189_p2 = scmp.lt.s32.totalorder %s1183_s15, %s1183_s15 }
   0x5   :  { %p1190_p3 = por %p1189_p2, %p1188_p1 }
   0x7   :  { %p1191_p4 = pnand %p1190_p3, %p1184_p0 }
   0x9   :  { %1194 = shalt.err (!%p1191_p4)  }
   0xa   :  { %s1349_s16 = smov [#allocation3]  }
   0xb   :  { %12 = dma.vmem_to_smem %s10_s14, 16, %s1349_s16, [#allocation2] }
   0xc   :  { %1287 = dma.done.wait [#allocation2], 16 }
   0xd   :  { %1288 = vsyncadd [#allocation2], 4294967280 }
   0xe   :  { %14 = sfence }
   0xf   :  { %s1376_s17 = smov 0   ;;  %s1378_s18 = smov 0  }
  0x10   :  { %s1380_s19 = smov 0   ;;  %s1382_s0 = smov 0  }
  0x11   :  { %s1384_s20 = smov 0   ;;  %s1386_s21 = smov 0  }
  0x12   :  { %s1388_s22 = smov 0  }
  0x13 LB: > { %s29_s23 = sadd.s32 1, %s1307_s20  ;;  %s32_s24 = sadd.s32 1, %s1311_s21  ;;  %s1315_s22 = sphi %s1388_s22, %s20_s22   ;;  %s1311_s21 = sphi %s1386_s21, %s1597_s21   ;;  %s1307_s20 = sphi %s1384_s20, %s1596_s20   ;;  %s1303_s0 = sphi %s1382_s0, %s1595_s0   ;;  %s1299_s19 = sphi %s1380_s19, %s1594_s19   ;;  %s1295_s18 = sphi %s1378_s18, %s1593_s18   ;;  %s1291_s17 = sphi %s1376_s17, %s1592_s17  }
  0x14   : > { %p30_p5 = scmp.ge.s32.totalorder %s29_s23, 2  ;;  %p48_p6 = scmp.ne.s32.totalorder %s1295_s18, %s1291_s17 }
  0x15   : > { %p49_p7 = scmp.eq.s32.totalorder %s1315_s22, 0  ;;  %s41_s28 = sadd.s32 1, %s1295_s18 }
  0x16   : > { %s1599_s23 = smov (%p30_p5, %s29_s23), 0  ;;  %s1601_s24 = smov (!%p30_p5, %s32_s24), %s1311_s21 }
  0x17   : > { %p50_p8 = por %p49_p7, %p48_p6  ;;  %p34_p9 = scmp.ge.s32.totalorder %s1601_s24, 3 }
  0x18   : > { %s37_s25 = ssub.s32 %s1307_s20, %s1599_s23  ;;  %p950_p11 = scmp.ge.s32.totalorder %s1315_s22, 6 }
  0x19   : > { %s1603_s24 = smov (%p34_p9, %s1601_s24), 0 }
  0x1a   : > { %s36_s26 = ssub.s32 %s1311_s21, %s1603_s24  ;;  %126 = sbr.rel (%p950_p11) target bundleno = 104 (0x68), region = 16 }
  0x1b   : > { %s38_s27 = sor.u32 %s37_s25, %s36_s26 }
  0x1c   : > { %p39_p10 = scmp.eq.s32.totalorder %s38_s27, 0 }
  0x1e   : > { %s1427_s29 = scalar_select %p39_p10, %s1295_s18, %s41_s28  }
  0x1f   : > { %129 = sbr.rel (!%p50_p8) target bundleno = 104 (0x68), region = 20  ;;  %s131_s30 = sand.u32 (%p50_p8), 1, %s1295_s18  }
  0x20   : > { %s134_s4 = smul.u32 (%p50_p8), 7, %s1307_s20  ;;  %s953_s6 = sshll.u32 (%p50_p8), %s1311_s21, 4 }
  0x21   : > { %s993_s5 = smul.u32 (%p50_p8), 112, %s131_s30 }
  0x22   : > { %s135_s7 = ssub.s32 (%p50_p8), 8, %s134_s4  ;;  %s141_s8 = sadd.s32 (%p50_p8), %s953_s6, %s134_s4 }
  0x23   : > { %p136_p12 = scmp.lt.s32.totalorder (%p50_p8), %s135_s7, 7  ;;  %s954_s9 = sshll.u32 (%p50_p8), %s141_s8, 3 }
  0x24   : > { %s1436_s12 = scalar_lea.vmem %s1589_s1, %s954_s9   ;;  %s1440_s15 = scalar_lea.vmem [#allocation4], %s993_s5  }
  0x25   : > { %s1605_s7 = smov (!%p136_p12, %s135_s7), 7 }
  0x26   : > { %s951_s13 = sshll.u32 %s1605_s7, 8  ;;  %s1438_s14 = sshll.u32 %s1605_s7, 3 }
  0x27   : > { %p956_p13 = scmp.eq.s32.totalorder %s951_s13, 0 }
  0x28   : > { %p148_p0 = scmp.lt.u32.totalorder (!%p956_p13), %s1438_s14, 8 }
  0x29   : > { %147 = sbr.rel (%p956_p13) target bundleno = 104 (0x68), region = 24 }
  0x2e   : > { %151 = sbr.rel (%p148_p0) target bundleno = 94 (0x5e), region = 28  ;;  %s1444_s16 = sand.u32 (!%p148_p0), 7, %s1438_s14  }
  0x2f   : > { %p170_p1 = scmp.eq.s32.totalorder (!%p148_p0), %s1444_s16, 0  ;;  %p957_p2 = scmp.ne.s32.totalorder (!%p148_p0), %s1444_s16, 0 }
  0x33   : > { %173 = sbr.rel (%p957_p2) target bundleno = 69 (0x45), region = 43  ;;  %s174_s25 = sshrl.u32 (!%p957_p2), %s1438_s14, 3 }
  0x34   : > { %s175_s26 = sshrl.u32 (!%p957_p2), %s174_s25, 5  ;;  %s1449_s27 = sand.u32 (!%p957_p2), 31, %s174_s25  }
  0x35   : > { %s987_s28 = sshll.u32 (!%p957_p2), %s175_s26, 12  ;;  %p964_p3 = scmp.le.s32.totalorder (!%p957_p2), %s1449_s27, 0 }
  0x36   : > { %s326_s30 = sshra.s32 (!%p957_p2), %s987_s28, 4 }
  0x37   : > { %s1452_s4 = scalar_lea.vmem (!%p957_p2), %s1436_s12, %s326_s30   ;;  %s330_s5 = scalar_lea.vmem (!%p957_p2), %s1440_s15, %s326_s30 [#allocation4]  }
  0x38   : > { %870 = sbr.rel (%p964_p3) target bundleno = 69 (0x45), region = 164  ;;  %s1317_s6 = smov (!%p964_p3), %s330_s5  }
  0x39   : > { %s1321_s7 = smov (!%p964_p3), %s1452_s4   ;;  %s1325_s8 = smov (!%p964_p3), 0  }
  0x3a   : > { %s1329_s9 = smov (!%p964_p3), 0  }
  0x3d LB: >> { %v342_v0 = vld [vmem:[%s1323_s7] sm:$0xff]  ;;  %s346_s10 = sadd.s32 1, %s1327_s8  ;;  %s336_s9 = sadd.s32 1, %s1331_s9   ;;  %s1331_s9 = sphi %s1329_s9, %s336_s9   ;;  %s1327_s8 = sphi %s1325_s8, %s1326_s8   ;;  %s1323_s7 = sphi %s1321_s7, %s351_s7   ;;  %s1319_s6 = sphi %s1317_s6, %s352_s6  }
  0x3e   : >> { %v344_v1 = vld [vmem:[%s1323_s7 + $0x40] sm:$0xff]  ;;  %343 = vst [vmem:[%s1319_s6] sm:$0xff] %v342_v0  ;;  %p347_p4 = scmp.ge.s32.totalorder %s346_s10, %s1449_s27  ;;  %p335_p5 = scmp.ge.s32.totalorder %s336_s9, %s1449_s27 }
  0x3f   : >> { %345 = vst [vmem:[%s1319_s6 + $0x38] sm:$0xff] %v344_v1 }
  0x40   : >> { %s1607_s10 = smov (%p347_p4, %s346_s10), 0  ;;  %338 = sbr.rel (!%p335_p5) target bundleno = 61 (0x3d), region = 170 }
  0x41   : >> { %s965_s11 = sshll.u32 %s1607_s10, 3  ;;  %s1326_s8 = smov %s1607_s10  }
  0x42   : >> { %s351_s7 = scalar_lea.vmem %s1452_s4, %s965_s11   ;;  %s352_s6 = scalar_lea.vmem %s330_s5, %s965_s11 [#allocation4]  }
  0x45 PF: > { %355 = sbr.rel (%p170_p1) target bundleno = 94 (0x5e), region = 61  ;;  %s357_s13 = ssub.s32 (!%p170_p1), %s1438_s14, %s1444_s16 }
  0x46   : > { %s361_s25 = sshrl.u32 (!%p170_p1), %s1438_s14, 3  ;;  %s1466_s26 = scalar_lea.vmem (!%p170_p1), %s1436_s12, %s357_s13 }
  0x47   : > { %s1469_s28 = scalar_lea.vmem (!%p170_p1), %s1440_s15, %s357_s13 [#allocation4]  ;;  %s362_s30 = sshrl.u32 (!%p170_p1), %s361_s25, 5 }
  0x48   : > { %s1471_s6 = sand.u32 (!%p170_p1), 31, %s361_s25   ;;  %s989_s27 = sshll.u32 (!%p170_p1), %s362_s30, 12 }
  0x49   : > { %s513_s4 = sshra.s32 (!%p170_p1), %s989_s27, 4  ;;  %p973_p6 = scmp.le.s32.totalorder (!%p170_p1), %s1471_s6, 0 }
  0x4a   : > { %s1474_s5 = scalar_lea.vmem %s1436_s12, %s513_s4   ;;  %s517_s7 = scalar_lea.vmem %s1440_s15, %s513_s4 [#allocation4]  }
  0x4b   : > { %898 = sbr.rel (%p973_p6) target bundleno = 88 (0x58), region = 186  ;;  %s1333_s8 = smov (!%p973_p6), %s517_s7  }
  0x4c   : > { %s1337_s9 = smov (!%p973_p6), %s1474_s5   ;;  %s1341_s10 = smov (!%p973_p6), 0  }
  0x4d   : > { %s1345_s11 = smov (!%p973_p6), 0  }
  0x50 LB: >> { %v529_v2 = vld [vmem:[%s1339_s9] sm:$0xff]  ;;  %s533_s13 = sadd.s32 1, %s1343_s10  ;;  %s523_s11 = sadd.s32 1, %s1347_s11   ;;  %s1347_s11 = sphi %s1345_s11, %s523_s11   ;;  %s1343_s10 = sphi %s1341_s10, %s1342_s10   ;;  %s1339_s9 = sphi %s1337_s9, %s538_s9   ;;  %s1335_s8 = sphi %s1333_s8, %s539_s8  }
  0x51   : >> { %v531_v3 = vld [vmem:[%s1339_s9 + $0x40] sm:$0xff]  ;;  %530 = vst [vmem:[%s1335_s8] sm:$0xff] %v529_v2  ;;  %p534_p7 = scmp.ge.s32.totalorder %s533_s13, %s1471_s6  ;;  %p522_p8 = scmp.ge.s32.totalorder %s523_s11, %s1471_s6 }
  0x52   : >> { %532 = vst [vmem:[%s1335_s8 + $0x38] sm:$0xff] %v531_v3 }
  0x53   : >> { %s1609_s13 = smov (%p534_p7, %s533_s13), 0  ;;  %525 = sbr.rel (!%p522_p8) target bundleno = 80 (0x50), region = 192 }
  0x54   : >> { %s974_s25 = sshll.u32 %s1609_s13, 3  ;;  %s1342_s10 = smov %s1609_s13  }
  0x55   : >> { %s538_s9 = scalar_lea.vmem %s1474_s5, %s974_s25   ;;  %s539_s8 = scalar_lea.vmem %s517_s7, %s974_s25 [#allocation4]  }
  0x58 PF: > { %s1350_s30 = smov 1  }
  0x59   : > { %s540_s27 = sshll.u32 %s1350_s30, %s1444_s16 }
  0x5a   : > { %s976_s4 = sadd.s32 4294967295, %s540_s27 }
  0x5b   : > { %v550_v4 = vld [vmem:[%s1466_s26] sm:%s976_s4] }
  0x5c   : > { %v552_v5 = vld [vmem:[%s1466_s26 + $0x40] sm:%s976_s4]  ;;  %551 = vst [vmem:[%s1469_s28] sm:%s976_s4] %v550_v4 }
  0x5d   : > { %553 = vst [vmem:[%s1469_s28 + $0x38] sm:%s976_s4] %v552_v5 }
  0x5e PF: > { %p977_p9 = scmp.ge.u32.totalorder %s1438_s14, 8 }
  0x5f   : > { %s1351_s8 = smov (!%p977_p9), 1  }
  0x60   : > { %154 = sbr.rel (%p977_p9) target bundleno = 104 (0x68), region = 32  ;;  %s155_s6 = sshll.u32 (!%p977_p9), %s1351_s8, %s1438_s14 }
  0x61   : > { %s978_s5 = sadd.s32 (!%p977_p9), 4294967295, %s155_s6 }
  0x65   : > { %v165_v6 = vld [vmem:[%s1436_s12] sm:%s978_s5] }
  0x66   : > { %v167_v7 = vld [vmem:[%s1436_s12 + $0x40] sm:%s978_s5]  ;;  %166 = vst [vmem:[%s1440_s15] sm:%s978_s5] %v165_v6 }
  0x67   : > { %168 = vst [vmem:[%s1440_s15 + $0x38] sm:%s978_s5] %v167_v7 }
  0x68 PF: > { %p979_p10 = scmp.ge.s32.totalorder %s1315_s22, 1  ;;  %p556_p11 = scmp.lt.s32.totalorder %s1315_s22, 7 }
  0x6a   : > { %p557_p12 = pnand %p979_p10, %p556_p11 }
  0x6b   : > { %s563_s16 = sand.u32 (!%p557_p12), 1, %s1291_s17   ;;  %p594_p13 = scmp.lt.s32.totalorder (!%p557_p12), %s1303_s0, 2 }
  0x6c   : > { %560 = sbr.rel (%p557_p12) target bundleno = 295 (0x127), region = 86  ;;  %p984_p0 = scmp.ne.s32.totalorder (!%p557_p12), %s1299_s19, 0 }
  0x6d   : > { %s994_s14 = smul.u32 (!%p557_p12), 112, %s563_s16 }
  0x6f   : > { %s1508_s13 = scalar_lea.vmem (!%p557_p12), [#allocation4], %s994_s14 }
  0x71   : > { %s595_s26 = scalar_select %p594_p13, %s1303_s0, 2 }
  0x72   : > { %607 = sbr.rel (%p984_p0) target bundleno = 122 (0x7a), region = 94 }
  0x73   : > { %s991_s12 = sshll.u32 %s595_s26, 4 }
  0x74   : > { %s1501_s7 = scalar_lea.vmem %s1590_s2, %s991_s12  ;;  %s1506_s11 = scalar_lea.vmem %s1591_s3, %s991_s12 }
  0x77   : > { %vm608_vm0 = vcmask 7168   ;;  %vm610_vm1 = vcmask 1024   ;;  %v1352_v8 = vmov 0.0  }
  0x78   : > { %609 = vst.msk [vmem:[%s1501_s7] sm:$0xff] %vm608_vm0, %v1352_v8  ;;  %612 = vst.msk [vmem:[%s1506_s11] sm:$0xff] %vm608_vm0, %v1352_v8 }
  0x79   : > { %611 = vst.msk [vmem:[%s1501_s7 + $0x8] sm:$0x3] %vm610_vm1, %v1352_v8  ;;  %613 = vst.msk [vmem:[%s1506_s11 + $0x8] sm:$0x3] %vm610_vm1, %v1352_v8 }
  0x7a PF: > { %s614_s17 = sld [smem:[#allocation3 + %s1303_s0]]  ;;  %v615_v9 = vlaneseq  ;;  %s623_s25 = smul.u32 896, %s1299_s19  ;;  %v640_v26 = vld [vmem:[%s1508_s13] sm:$0xff]  ;;  %v641_v27 = vld [vmem:[%s1508_s13 + $0x8] sm:$0xff]  ;;  %v642_v28 = vld [vmem:[%s1508_s13 + $0x10] sm:$0xff]  ;;  %vm692_vm2 = vcmask 1041408  }
  0x7b   : > { %v643_v29 = vld [vmem:[%s1508_s13 + $0x18] sm:$0xff]  ;;  %v644_v30 = vld [vmem:[%s1508_s13 + $0x20] sm:$0xff]  ;;  %v645_v31 = vld [vmem:[%s1508_s13 + $0x28] sm:$0xff]  ;;  %vm710_vm10 = vcmask 7168   ;;  %vm712_vm11 = vcmask 1024  }
  0x7c   : > { %v616_v10 = vand.u32 127, %v615_v9  ;;  %v624_v11 = vstv %s623_s25  ;;  %v647_v32 = vld [vmem:[%s1508_s13 + $0x38] sm:$0x3]  ;;  %v648_v33 = vld [vmem:[%s1508_s13 + $0x40] sm:$0x3]  ;;  %v646_v35 = vld [vmem:[%s1508_s13 + $0x30] sm:$0xff] }
  0x7d   : > { %v649_v34 = vld [vmem:[%s1508_s13 + $0x48] sm:$0x3]  ;;  %v650_v36 = vld [vmem:[%s1508_s13 + $0x50] sm:$0x3]  ;;  %v651_v40 = vld [vmem:[%s1508_s13 + $0x58] sm:$0x3] }
  0x7e   : > { %v617_v12 = vadd.s32 128, %v616_v10  ;;  %v618_v13 = vadd.s32 256, %v616_v10  ;;  %v619_v14 = vadd.s32 384, %v616_v10  ;;  %v620_v15 = vadd.s32 512, %v616_v10  ;;  %v652_v41 = vld [vmem:[%s1508_s13 + $0x60] sm:$0x3] }
  0x7f   : > { %v621_v16 = vadd.s32 640, %v616_v10  ;;  %v622_v17 = vadd.s32 768, %v616_v10  ;;  %v625_v18 = vadd.s32 %v624_v11, %v616_v10  ;;  %v653_v48 = vld [vmem:[%s1508_s13 + $0x68] sm:$0x3] }
  0x80   : > { %v626_v19 = vadd.s32 %v624_v11, %v617_v12  ;;  %v627_v20 = vadd.s32 %v624_v11, %v618_v13  ;;  %v628_v21 = vadd.s32 %v624_v11, %v619_v14  ;;  %v629_v22 = vadd.s32 %v624_v11, %v620_v15 }
  0x81   : > { %v630_v23 = vadd.s32 %v624_v11, %v621_v16  ;;  %v631_v24 = vadd.s32 %v624_v11, %v622_v17  ;;  %v632_v25 = vstv %s614_s17 }
  0x82   : > { %vm633_vm3 = vcmp.lt.s32.totalorder %v625_v18, %v632_v25  ;;  %vm634_vm4 = vcmp.lt.s32.totalorder %v626_v19, %v632_v25  ;;  %vm635_vm5 = vcmp.lt.s32.totalorder %v627_v20, %v632_v25  ;;  %vm636_vm6 = vcmp.lt.s32.totalorder %v628_v21, %v632_v25 }
  0x83   : > { %vm637_vm7 = vcmp.lt.s32.totalorder %v629_v22, %v632_v25  ;;  %vm638_vm8 = vcmp.lt.s32.totalorder %v630_v23, %v632_v25  ;;  %v668_v37 = vsel %vm633_vm3, %v640_v26, 0.0  ;;  %v669_v38 = vsel %vm634_vm4, %v641_v27, 0.0 }
  0x84   : > { %v670_v39 = vsel %vm635_vm5, %v642_v28, 0.0  ;;  %vm639_vm9 = vcmp.lt.s32.totalorder %v631_v24, %v632_v25  ;;  %v671_v42 = vsel %vm636_vm6, %v643_v29, 0.0  ;;  %v672_v43 = vsel %vm637_vm7, %v644_v30, 0.0 }
  0x85   : > { %v673_v44 = vsel %vm638_vm8, %v645_v31, 0.0  ;;  %v675_v45 = vsel %vm633_vm3, %v647_v32, 0.0  ;;  %v676_v46 = vsel %vm634_vm4, %v648_v33, 0.0  ;;  %v677_v47 = vsel %vm635_vm5, %v649_v34, 0.0 }
  0x86   : > { %v678_v49 = vsel %vm636_vm6, %v650_v36, 0.0  ;;  %v716_v50 = vmul.f32 %v668_v37, %v668_v37  ;;  %v717_v51 = vmul.f32 %v669_v38, %v669_v38  ;;  %v718_v52 = vmul.f32 %v670_v39, %v670_v39 }
  0x87   : > { %v674_v53 = vsel %vm639_vm9, %v646_v35, 0.0  ;;  %v679_v54 = vsel %vm637_vm7, %v651_v40, 0.0  ;;  %v680_v55 = vsel %vm638_vm8, %v652_v41, 0.0  ;;  %v719_v56 = vmul.f32 %v671_v42, %v671_v42 }
  0x88   : > { %v730_v57 = vadd.f32 %v717_v51, %v716_v50  ;;  %v684_v58 = vadd.f32 %v669_v38, %v668_v37  ;;  %v723_v59 = vmul.f32 %v675_v45, %v675_v45  ;;  %v724_v60 = vmul.f32 %v676_v46, %v676_v46  ;;  %v683_v50 = vld [vmem:[%s1501_s7 + $0x8] sm:$0x3] }
  0x89   : > { %v681_v61 = vsel %vm639_vm9, %v653_v48, 0.0  ;;  %v720_v62 = vmul.f32 %v672_v43, %v672_v43  ;;  %v725_v63 = vmul.f32 %v677_v47, %v677_v47  ;;  %v726_v0 = vmul.f32 %v678_v49, %v678_v49  ;;  %v715_v48 = vld [vmem:[%s1506_s11 + $0x8] sm:$0x3] }
  0x8a   : > { %v721_v1 = vmul.f32 %v673_v44, %v673_v44  ;;  %v731_v2 = vadd.f32 %v730_v57, %v718_v52  ;;  %v685_v3 = vadd.f32 %v684_v58, %v670_v39  ;;  %v738_v4 = vsel %vm692_vm2, %v723_v59, 0.0 }
  0x8b   : > { %v722_v5 = vmul.f32 %v674_v53, %v674_v53  ;;  %v727_v6 = vmul.f32 %v679_v54, %v679_v54  ;;  %v739_v7 = vsel %vm692_vm2, %v724_v60, 0.0  ;;  %v741_v8 = vsel %vm692_vm2, %v725_v63, 0.0 }
  0x8c   : > { %v732_v9 = vadd.f32 %v731_v2, %v719_v56  ;;  %v686_v10 = vadd.f32 %v685_v3, %v671_v42  ;;  %v728_v11 = vmul.f32 %v680_v55, %v680_v55  ;;  %v740_v12 = vadd.f32 %v739_v7, %v738_v4  ;;  %v714_v42 = vld [vmem:[%s1506_s11] sm:$0xff] }
  0x8d   : > { %v743_v13 = vsel %vm692_vm2, %v726_v0, 0.0  ;;  %v693_v14 = vsel %vm692_vm2, %v675_v45, 0.0  ;;  %v694_v15 = vsel %vm692_vm2, %v676_v46, 0.0  ;;  %v696_v16 = vsel %vm692_vm2, %v677_v47, 0.0 }
  0x8e   : > { %v733_v17 = vadd.f32 %v732_v9, %v720_v62  ;;  %v687_v18 = vadd.f32 %v686_v10, %v672_v43  ;;  %v742_v19 = vadd.f32 %v741_v8, %v740_v12  ;;  %v695_v20 = vadd.f32 %v694_v15, %v693_v14  ;;  %v682_v43 = vld [vmem:[%s1501_s7] sm:$0xff] }
  0x8f   : > { %v729_v21 = vmul.f32 %v681_v61, %v681_v61  ;;  %v745_v22 = vsel %vm692_vm2, %v727_v6, 0.0  ;;  %v698_v23 = vsel %vm692_vm2, %v678_v49, 0.0  ;;  %v747_v28 = vsel %vm692_vm2, %v728_v11, 0.0 }
  0x90   : > { %v734_v24 = vadd.f32 %v733_v17, %v721_v1  ;;  %v688_v25 = vadd.f32 %v687_v18, %v673_v44  ;;  %v744_v26 = vadd.f32 %v743_v13, %v742_v19  ;;  %v697_v27 = vadd.f32 %v696_v16, %v695_v20 }
  0x91   : > { %v700_v29 = vsel %vm692_vm2, %v679_v54, 0.0  ;;  %v749_v34 = vsel %vm692_vm2, %v729_v21, 0.0  ;;  %v702_v35 = vsel %vm692_vm2, %v680_v55, 0.0  ;;  %v704_v38 = vsel %vm692_vm2, %v681_v61, 0.0 }
  0x92   : > { %v735_v30 = vadd.f32 %v734_v24, %v722_v5  ;;  %v689_v31 = vadd.f32 %v688_v25, %v674_v53  ;;  %v746_v32 = vadd.f32 %v745_v22, %v744_v26  ;;  %v699_v33 = vadd.f32 %v698_v23, %v697_v27 }
  0x94   : > { %736 = vadd.xlane.f32.xlu1 %v735_v30  ;;  %690 = vadd.xlane.f32.xlu0 %v689_v31  ;;  %v748_v36 = vadd.f32 %v747_v28, %v746_v32  ;;  %v701_v37 = vadd.f32 %v700_v29, %v699_v33 }
  0x96   : > { %v750_v39 = vadd.f32 %v749_v34, %v748_v36  ;;  %v703_v40 = vadd.f32 %v702_v35, %v701_v37 }
  0x98   : > { %751 = vadd.xlane.f32.xlu1 %v750_v39  ;;  %v705_v41 = vadd.f32 %v704_v38, %v703_v40 }
  0x9a   : > { %706 = vadd.xlane.f32.xlu0 %v705_v41 }
 0x11d   : > { %v737_v44 = vpop.xlane.xlu1 %736  ;;  %v691_v45 = vpop.xlane.xlu0 %690 }
 0x11e   : > { %v753_v46 = vadd.f32 %v737_v44, %v714_v42  ;;  %v708_v47 = vadd.f32 %v691_v45, %v682_v43 }
 0x120   : > { %755 = vst.msk [vmem:[%s1506_s11] sm:$0xff] %vm710_vm10, %v753_v46  ;;  %711 = vst.msk [vmem:[%s1501_s7] sm:$0xff] %vm710_vm10, %v708_v47 }
 0x121   : > { %v752_v49 = vpop.xlane.xlu1 %751 }
 0x122   : > { %v754_v51 = vadd.f32 %v752_v49, %v715_v48 }
 0x123   : > { %v707_v52 = vpop.xlane.xlu0 %706 }
 0x124   : > { %756 = vst.msk [vmem:[%s1506_s11 + $0x8] sm:$0x3] %vm712_vm11, %v754_v51  ;;  %v709_v53 = vadd.f32 %v707_v52, %v683_v50 }
 0x126   : > { %713 = vst.msk [vmem:[%s1501_s7 + $0x8] sm:$0x3] %vm712_vm11, %v709_v53 }
 0x127 PF: > { %s20_s22 = sadd.s32 1, %s1315_s22   ;;  %s1592_s17 = smov %s1295_s18 }
 0x128   : > { %p17_p1 = scmp.ge.s32.totalorder %s20_s22, 8   ;;  %s1593_s18 = smov %s1427_s29 }
 0x129   : > { %s1594_s19 = smov %s1307_s20  ;;  %s1595_s0 = smov %s1311_s21 }
 0x12a   : > { %s1596_s20 = smov %s1599_s23  ;;  %s1597_s21 = smov %s1603_s24 }
 0x12b   :  { %19 = sbr.rel (!%p17_p1) target bundleno = 19 (0x13), region = 203 }

// kernel: normalization_forward.3
= control target key start
LH: loop header
LB: loop body
LE: loop exit
PB: predicated region body
PF: predicated region fallthrough
CT: control target
= control target key end

     0   :  { %s2834_s0 = inlined_call_operand.vmem [shape: s32[3], index: 0, kind: input, shape index: {}]   ;;  %s2835_s1 = inlined_call_operand.vmem [shape: f32[3,10,1000], index: 1, kind: input, shape index: {}]   ;;  %s2836_s2 = inlined_call_operand.vmem [shape: f32[1,10,1], index: 2, kind: input, shape index: {}]   ;;  %s2837_s3 = inlined_call_operand.vmem [shape: f32[1,10,1], index: 3, kind: input, shape index: {}]   ;;  %s2838_s4 = inlined_call_operand.vmem [shape: f32[1,10,1], index: 4, kind: input, shape index: {}]   ;;  %s2839_s5 = inlined_call_operand.vmem [shape: f32[1,10,1], index: 5, kind: input, shape index: {}]   ;;  %s2840_s6 = inlined_call_operand.vmem [shape: f32[3,10,1000], index: 6, kind: output, shape index: {}]  }
   0x1   :  { %2844 = sst [smem:[#allocation10_spill]] %s2835_s1  ;;  %s11_s23 = sshll.u32 %s2834_s0, 4  ;;  %s12_s23 = int_to_ptr.vmem [resolvable:$true] %s11_s23 }
   0x2   :  { %s1888_s24 = scalar_lea.vmem %s12_s23, 16  ;;  %p1893_p1 = scmp.lt.s32.totalorder %s12_s23, %s12_s23 }
   0x3   :  { %p1889_p0 = scmp.ne.s32.totalorder %s12_s23, %s1888_s24  ;;  %p1894_p2 = scmp.lt.s32.totalorder %s1888_s24, %s1888_s24 }
   0x5   :  { %p1895_p3 = por %p1894_p2, %p1893_p1 }
   0x7   :  { %p1896_p4 = pnand %p1895_p3, %p1889_p0 }
   0x9   :  { %1899 = shalt.err (!%p1896_p4)  }
   0xa   :  { %s2182_s25 = smov [#allocation3]  }
   0xb   :  { %14 = dma.vmem_to_smem %s12_s23, 16, %s2182_s25, [#allocation2] }
   0xc   :  { %2056 = dma.done.wait [#allocation2], 16 }
   0xd   :  { %2057 = vsyncadd [#allocation2], 4294967280 }
   0xe   :  { %16 = sfence }
   0xf   :  { %s2226_s26 = smov 0   ;;  %s2228_s27 = smov 0  }
  0x10   :  { %s2230_s28 = smov 0   ;;  %s2232_s0 = smov 0  }
  0x11   :  { %s2234_s29 = smov 0   ;;  %s2236_s30 = smov 0  }
  0x12   :  { %s2238_s7 = smov 0  }
  0x13 LB: > { %2845 = sst [smem:[#allocation7_spill]] %s2080_s30  ;;  %s31_s8 = sadd.s32 1, %s2076_s29  ;;  %s2084_s7 = sphi %s2238_s7, %s22_s7   ;;  %s2080_s30 = sphi %s2236_s30, %s2862_s30   ;;  %s2076_s29 = sphi %s2234_s29, %s2866_s29   ;;  %s2072_s0 = sphi %s2232_s0, %s2860_s0   ;;  %s2068_s28 = sphi %s2230_s28, %s2865_s28   ;;  %s2064_s27 = sphi %s2228_s27, %s2864_s27   ;;  %s2060_s26 = sphi %s2226_s26, %s2863_s26  }
  0x14   : > { %p32_p5 = scmp.ge.s32.totalorder %s31_s8, 2  ;;  %s34_s9 = sadd.s32 1, %s2080_s30 }
  0x15   : > { %s1491_s10 = sadd.s32 4294967295, %s2084_s7   ;;  %p50_p6 = scmp.ne.s32.totalorder %s2064_s27, %s2060_s26 }
  0x16   : > { %s2868_s8 = smov (%p32_p5, %s31_s8), 0  ;;  %s2870_s9 = smov (!%p32_p5, %s34_s9), %s2080_s30 }
  0x17   : > { %2846 = sst [smem:[#allocation8_spill]] %s2868_s8  ;;  %p51_p7 = scmp.eq.s32.totalorder %s2084_s7, 0 }
  0x18   : > { %p36_p8 = scmp.ge.s32.totalorder %s2870_s9, 3  ;;  %p166_p9 = scmp.eq.s32.totalorder %s1491_s10, 5 }
  0x19   : > { %s39_s11 = ssub.s32 %s2076_s29, %s2868_s8  ;;  %p52_p10 = por %p51_p7, %p50_p6 }
  0x1a   : > { %s2872_s9 = smov (%p36_p8, %s2870_s9), 0  ;;  %p2274_p11 = por %p166_p9, %p50_p6 }
  0x1b   : > { %2847 = sst [smem:[#allocation9_spill]] %s2872_s9  ;;  %s38_s13 = ssub.s32 %s2080_s30, %s2872_s9 }
  0x1c   : > { %s40_s14 = sor.u32 %s39_s11, %s38_s13  ;;  %s43_s15 = sadd.s32 1, %s2064_s27 }
  0x1d   : > { %p41_p12 = scmp.eq.s32.totalorder %s40_s14, 0  ;;  %p1494_p13 = scmp.ge.s32.totalorder %s2084_s7, 6 }
  0x1f   : > { %s2282_s16 = scalar_select %p41_p12, %s2064_s27, %s43_s15  }
  0x20   : > { %200 = sbr.rel (%p1494_p13) target bundleno = 110 (0x6e), region = 32 }
  0x25   : > { %203 = sbr.rel (!%p52_p10) target bundleno = 110 (0x6e), region = 36  ;;  %s205_s17 = sand.u32 (%p52_p10), 1, %s2064_s27  }
  0x26   : > { %s208_s18 = smul.u32 (%p52_p10), 7, %s2076_s29  ;;  %s1497_s20 = sshll.u32 (%p52_p10), %s2080_s30, 4 }
  0x27   : > { %s1562_s19 = smul.u32 (%p52_p10), 112, %s205_s17  ;;  %s2849_s1 = sld [smem:[#allocation10_spill]] (%p52_p10) }
  0x28   : > { %s209_s21 = ssub.s32 (%p52_p10), 8, %s208_s18  ;;  %s215_s22 = sadd.s32 (%p52_p10), %s1497_s20, %s208_s18 }
  0x29   : > { %p210_p0 = scmp.lt.s32.totalorder (%p52_p10), %s209_s21, 7  ;;  %s1498_s23 = sshll.u32 (%p52_p10), %s215_s22, 3 }
  0x2a   : > { %s2295_s14 = scalar_lea.vmem [#allocation4], %s1562_s19  }
  0x2b   : > { %s2874_s21 = smov (!%p210_p0, %s209_s21), 7 }
  0x2c   : > { %s1495_s11 = sshll.u32 %s2874_s21, 8  ;;  %s2293_s13 = sshll.u32 %s2874_s21, 3 }
  0x2d   : > { %s2291_s10 = scalar_lea.vmem %s2849_s1, %s1498_s23   ;;  %p1500_p1 = scmp.eq.s32.totalorder %s1495_s11, 0 }
  0x2e   : > { %p222_p2 = scmp.lt.u32.totalorder (!%p1500_p1), %s2293_s13, 8 }
  0x2f   : > { %221 = sbr.rel (%p1500_p1) target bundleno = 110 (0x6e), region = 40 }
  0x34   : > { %225 = sbr.rel (%p222_p2) target bundleno = 100 (0x64), region = 44  ;;  %s2299_s15 = sand.u32 (!%p222_p2), 7, %s2293_s13  }
  0x35   : > { %p244_p3 = scmp.eq.s32.totalorder (!%p222_p2), %s2299_s15, 0  ;;  %p1501_p4 = scmp.ne.s32.totalorder (!%p222_p2), %s2299_s15, 0 }
  0x39   : > { %247 = sbr.rel (%p1501_p4) target bundleno = 75 (0x4b), region = 59  ;;  %s248_s17 = sshrl.u32 (!%p1501_p4), %s2293_s13, 3 }
  0x3a   : > { %s249_s18 = sshrl.u32 (!%p1501_p4), %s248_s17, 5  ;;  %s2304_s19 = sand.u32 (!%p1501_p4), 31, %s248_s17  }
  0x3b   : > { %s1554_s20 = sshll.u32 (!%p1501_p4), %s249_s18, 12  ;;  %p1508_p5 = scmp.le.s32.totalorder (!%p1501_p4), %s2304_s19, 0 }
  0x3c   : > { %s400_s21 = sshra.s32 (!%p1501_p4), %s1554_s20, 4 }
  0x3d   : > { %s2307_s22 = scalar_lea.vmem (!%p1501_p4), %s2291_s10, %s400_s21   ;;  %s404_s23 = scalar_lea.vmem (!%p1501_p4), %s2295_s14, %s400_s21 [#allocation4]  }
  0x3e   : > { %1366 = sbr.rel (%p1508_p5) target bundleno = 75 (0x4b), region = 248  ;;  %s2086_s24 = smov (!%p1508_p5), %s404_s23  }
  0x3f   : > { %s2090_s25 = smov (!%p1508_p5), %s2307_s22   ;;  %s2094_s11 = smov (!%p1508_p5), 0  }
  0x40   : > { %s2098_s1 = smov (!%p1508_p5), 0  }
  0x43 LB: >> { %v416_v0 = vld [vmem:[%s2092_s25] sm:$0xff]  ;;  %s420_s17 = sadd.s32 1, %s2096_s11  ;;  %s410_s1 = sadd.s32 1, %s2100_s1   ;;  %s2100_s1 = sphi %s2098_s1, %s410_s1   ;;  %s2096_s11 = sphi %s2094_s11, %s2095_s11   ;;  %s2092_s25 = sphi %s2090_s25, %s425_s25   ;;  %s2088_s24 = sphi %s2086_s24, %s426_s24  }
  0x44   : >> { %v418_v1 = vld [vmem:[%s2092_s25 + $0x40] sm:$0xff]  ;;  %417 = vst [vmem:[%s2088_s24] sm:$0xff] %v416_v0  ;;  %p421_p6 = scmp.ge.s32.totalorder %s420_s17, %s2304_s19  ;;  %p409_p7 = scmp.ge.s32.totalorder %s410_s1, %s2304_s19 }
  0x45   : >> { %419 = vst [vmem:[%s2088_s24 + $0x38] sm:$0xff] %v418_v1 }
  0x46   : >> { %s2876_s17 = smov (%p421_p6, %s420_s17), 0  ;;  %412 = sbr.rel (!%p409_p7) target bundleno = 67 (0x43), region = 254 }
  0x47   : >> { %s1509_s18 = sshll.u32 %s2876_s17, 3  ;;  %s2095_s11 = smov %s2876_s17  }
  0x48   : >> { %s425_s25 = scalar_lea.vmem %s2307_s22, %s1509_s18   ;;  %s426_s24 = scalar_lea.vmem %s404_s23, %s1509_s18 [#allocation4]  }
  0x4b PF: > { %429 = sbr.rel (%p244_p3) target bundleno = 100 (0x64), region = 77  ;;  %s431_s20 = ssub.s32 (!%p244_p3), %s2293_s13, %s2299_s15 }
  0x4c   : > { %s435_s21 = sshrl.u32 (!%p244_p3), %s2293_s13, 3  ;;  %s2321_s11 = scalar_lea.vmem (!%p244_p3), %s2291_s10, %s431_s20 }
  0x4d   : > { %s2324_s24 = scalar_lea.vmem (!%p244_p3), %s2295_s14, %s431_s20 [#allocation4]  ;;  %s436_s1 = sshrl.u32 (!%p244_p3), %s435_s21, 5 }
  0x4e   : > { %s2326_s25 = sand.u32 (!%p244_p3), 31, %s435_s21   ;;  %s1556_s19 = sshll.u32 (!%p244_p3), %s436_s1, 12 }
  0x4f   : > { %s587_s22 = sshra.s32 (!%p244_p3), %s1556_s19, 4  ;;  %p1517_p8 = scmp.le.s32.totalorder (!%p244_p3), %s2326_s25, 0 }
  0x50   : > { %s2329_s23 = scalar_lea.vmem %s2291_s10, %s587_s22   ;;  %s591_s17 = scalar_lea.vmem %s2295_s14, %s587_s22 [#allocation4]  }
  0x51   : > { %1394 = sbr.rel (%p1517_p8) target bundleno = 94 (0x5e), region = 270  ;;  %s2102_s18 = smov (!%p1517_p8), %s591_s17  }
  0x52   : > { %s2106_s9 = smov (!%p1517_p8), %s2329_s23   ;;  %s2110_s8 = smov (!%p1517_p8), 0  }
  0x53   : > { %s2114_s30 = smov (!%p1517_p8), 0  }
  0x56 LB: >> { %v603_v2 = vld [vmem:[%s2108_s9] sm:$0xff]  ;;  %s607_s20 = sadd.s32 1, %s2112_s8  ;;  %s597_s30 = sadd.s32 1, %s2116_s30   ;;  %s2116_s30 = sphi %s2114_s30, %s597_s30   ;;  %s2112_s8 = sphi %s2110_s8, %s2111_s8   ;;  %s2108_s9 = sphi %s2106_s9, %s612_s9   ;;  %s2104_s18 = sphi %s2102_s18, %s613_s18  }
  0x57   : >> { %v605_v3 = vld [vmem:[%s2108_s9 + $0x40] sm:$0xff]  ;;  %604 = vst [vmem:[%s2104_s18] sm:$0xff] %v603_v2  ;;  %p608_p9 = scmp.ge.s32.totalorder %s607_s20, %s2326_s25  ;;  %p596_p10 = scmp.ge.s32.totalorder %s597_s30, %s2326_s25 }
  0x58   : >> { %606 = vst [vmem:[%s2104_s18 + $0x38] sm:$0xff] %v605_v3 }
  0x59   : >> { %s2878_s20 = smov (%p608_p9, %s607_s20), 0  ;;  %599 = sbr.rel (!%p596_p10) target bundleno = 86 (0x56), region = 276 }
  0x5a   : >> { %s1518_s21 = sshll.u32 %s2878_s20, 3  ;;  %s2111_s8 = smov %s2878_s20  }
  0x5b   : >> { %s612_s9 = scalar_lea.vmem %s2329_s23, %s1518_s21   ;;  %s613_s18 = scalar_lea.vmem %s591_s17, %s1518_s21 [#allocation4]  }
  0x5e PF: > { %s2183_s1 = smov 1  }
  0x5f   : > { %s614_s8 = sshll.u32 %s2183_s1, %s2299_s15 }
  0x60   : > { %s1520_s19 = sadd.s32 4294967295, %s614_s8 }
  0x61   : > { %v624_v4 = vld [vmem:[%s2321_s11] sm:%s1520_s19] }
  0x62   : > { %v626_v5 = vld [vmem:[%s2321_s11 + $0x40] sm:%s1520_s19]  ;;  %625 = vst [vmem:[%s2324_s24] sm:%s1520_s19] %v624_v4 }
  0x63   : > { %627 = vst [vmem:[%s2324_s24 + $0x38] sm:%s1520_s19] %v626_v5 }
  0x64 PF: > { %p1521_p12 = scmp.ge.u32.totalorder %s2293_s13, 8 }
  0x65   : > { %s2184_s30 = smov (!%p1521_p12), 1  }
  0x66   : > { %228 = sbr.rel (%p1521_p12) target bundleno = 110 (0x6e), region = 48  ;;  %s229_s9 = sshll.u32 (!%p1521_p12), %s2184_s30, %s2293_s13 }
  0x67   : > { %s1522_s25 = sadd.s32 (!%p1521_p12), 4294967295, %s229_s9 }
  0x6b   : > { %v239_v6 = vld [vmem:[%s2291_s10] sm:%s1522_s25] }
  0x6c   : > { %v241_v7 = vld [vmem:[%s2291_s10 + $0x40] sm:%s1522_s25]  ;;  %240 = vst [vmem:[%s2295_s14] sm:%s1522_s25] %v239_v6 }
  0x6d   : > { %242 = vst [vmem:[%s2295_s14 + $0x38] sm:%s1522_s25] %v241_v7 }
  0x6e PF: > { %p1523_p13 = scmp.ge.s32.totalorder %s2084_s7, 1  ;;  %p630_p0 = scmp.lt.s32.totalorder %s2084_s7, 7 }
  0x70   : > { %p631_p1 = pnand %p1523_p13, %p630_p0 }
  0x71   : > { %s637_s9 = sand.u32 (!%p631_p1), 1, %s2060_s26   ;;  %s673_s25 = sld [smem:[#allocation3 + %s2072_s0]] (!%p631_p1) }
  0x72   : > { %634 = sbr.rel (%p631_p1) target bundleno = 405 (0x195), region = 102 }
  0x73   : > { %s682_s15 = smul.u32 (!%p631_p1), 896, %s2068_s28 }
  0x74   : > { %s2377_s11 = smul.u32 (!%p631_p1), 112, %s637_s9 }
  0x76   : > { %s2390_s26 = scalar_lea.vmem (!%p631_p1), [#allocation4], %s2377_s11  ;;  %s2430_s13 = scalar_lea.vmem (!%p631_p1), [#allocation5], %s2377_s11  }
  0x77   : > { %v691_v8 = vld [vmem:[%s2836_s2] sm:$0xff]  ;;  %v2185_v10 = vmov 0   ;;  %v692_v12 = vld [vmem:[%s2836_s2 + $0x8] sm:$0x3]  ;;  %v674_v31 = vlaneseq  ;;  %v683_v36 = vstv %s682_s15  ;;  %v2387_v44 = vstv %s673_s25  ;;  %s832_s24 = smul.u32 (%p2274_p11), 7, %s2068_s28  ;;  %s1526_s10 = sshll.u32 (%p2274_p11), %s2072_s0, 4 }
  0x78   : > { %v693_v9 = vld [vmem:[%s2837_s3] sm:$0xff]  ;;  %1882 = vset.pattern.permute.xlu0 %v2185_v10  ;;  %v695_v11 = vmul.f32 %v691_v8, %v691_v8  ;;  %1883 = vset.pattern.permute.xlu1 %v2185_v10  ;;  %v694_v13 = vld [vmem:[%s2837_s3 + $0x8] sm:$0x3]  ;;  %v696_v14 = vmul.f32 %v692_v12, %v692_v12 }
  0x79   : > { %v703_v19 = vld [vmem:[%s2838_s4] sm:$0xff]  ;;  %v704_v20 = vld [vmem:[%s2838_s4 + $0x8] sm:$0x3]  ;;  %v675_v32 = vand.u32 127, %v674_v31  ;;  %s833_s14 = ssub.s32 (%p2274_p11), 8, %s832_s24  ;;  %s839_s22 = sadd.s32 (%p2274_p11), %s1526_s10, %s832_s24 }
  0x7a   : > { %v697_v15 = vsub.f32 %v693_v9, %v695_v11  ;;  %v698_v16 = vsub.f32 %v694_v13, %v696_v14  ;;  %v707_v25 = vld [vmem:[%s2839_s5] sm:$0xff]  ;;  %v708_v27 = vld [vmem:[%s2839_s5 + $0x8] sm:$0x3]  ;;  %p834_p2 = scmp.lt.s32.totalorder (%p2274_p11), %s833_s14, 7  ;;  %s1527_s23 = sshll.u32 (%p2274_p11), %s839_s22, 3 }
  0x7b   : > { %v676_v33 = vadd.s32 128, %v675_v32  ;;  %v677_v34 = vadd.s32 256, %v675_v32  ;;  %v678_v35 = vadd.s32 384, %v675_v32  ;;  %v679_v37 = vadd.s32 512, %v675_v32  ;;  %v713_v45 = vld [vmem:[%s2390_s26] sm:$0xff]  ;;  %v714_v46 = vld [vmem:[%s2390_s26 + $0x8] sm:$0xff]  ;;  %s2492_s20 = scalar_lea.vmem (%p2274_p11), %s2840_s6, %s1527_s23  }
  0x7c   : > { %v699_v17 = vadd.f32 1e-05, %v697_v15  ;;  %v700_v18 = vadd.f32 1e-05, %v698_v16  ;;  %v680_v38 = vadd.s32 640, %v675_v32  ;;  %v681_v39 = vadd.s32 768, %v675_v32 }
  0x7d   : > { %v2379_v40 = vadd.s32 %v683_v36, %v675_v32  ;;  %v2381_v41 = vadd.s32 %v683_v36, %v676_v33  ;;  %v2383_v42 = vadd.s32 %v683_v36, %v677_v34  ;;  %v2385_v43 = vadd.s32 %v683_v36, %v678_v35  ;;  %v715_v48 = vld [vmem:[%s2390_s26 + $0x10] sm:$0xff]  ;;  %v716_v49 = vld [vmem:[%s2390_s26 + $0x18] sm:$0xff]  ;;  %v717_v50 = vld [vmem:[%s2390_s26 + $0x20] sm:$0xff] }
  0x7e   : > { %1884 = vrsqrt.f32 %v699_v17  ;;  %v2397_v51 = vadd.s32 %v683_v36, %v679_v37  ;;  %v2399_v52 = vadd.s32 %v683_v36, %v680_v38  ;;  %v718_v53 = vld [vmem:[%s2390_s26 + $0x28] sm:$0xff]  ;;  %v719_v54 = vld [vmem:[%s2390_s26 + $0x30] sm:$0xff]  ;;  %v2403_v55 = vadd.s32 %v683_v36, %v681_v39  ;;  %v720_v57 = vld [vmem:[%s2390_s26 + $0x38] sm:$0x3] }
  0x7f   : > { %1886 = vrsqrt.f32 %v700_v18  ;;  %vm728_vm0 = vcmp.lt.s32.totalorder %v2379_v40, %v2387_v44  ;;  %v721_v58 = vld [vmem:[%s2390_s26 + $0x40] sm:$0x3]  ;;  %v722_v59 = vld [vmem:[%s2390_s26 + $0x48] sm:$0x3]  ;;  %vm729_vm1 = vcmp.lt.s32.totalorder %v2381_v41, %v2387_v44  ;;  %vm730_vm2 = vcmp.lt.s32.totalorder %v2383_v42, %v2387_v44  ;;  %v723_v0 = vld [vmem:[%s2390_s26 + $0x50] sm:$0x3] }
  0x80   : > { %vm731_vm3 = vcmp.lt.s32.totalorder %v2385_v43, %v2387_v44  ;;  %v724_v1 = vld [vmem:[%s2390_s26 + $0x58] sm:$0x3]  ;;  %v725_v2 = vld [vmem:[%s2390_s26 + $0x60] sm:$0x3]  ;;  %vm732_vm4 = vcmp.lt.s32.totalorder %v2397_v51, %v2387_v44  ;;  %vm733_vm5 = vcmp.lt.s32.totalorder %v2399_v52, %v2387_v44  ;;  %v726_v7 = vld [vmem:[%s2390_s26 + $0x68] sm:$0x3]  ;;  %vm734_vm6 = vcmp.lt.s32.totalorder %v2403_v55, %v2387_v44 }
  0x8b   : > { %v1885_v21 = vpop.eup %1884 }
  0x8c   : > { %v1887_v22 = vpop.eup %1886  ;;  %v705_v23 = vmul.f32 %v1885_v21, %v703_v19 }
  0x8d   : > { %v706_v24 = vmul.f32 %v1887_v22, %v704_v20 }
  0x8e   : > { %737 = vperm.xlu0 %1882, %v705_v23   ;;  %v709_v26 = vmul.f32 %v705_v23, %v691_v8 }
  0x8f   : > { %v710_v28 = vmul.f32 %v706_v24, %v692_v12 }
  0x90   : > { %v711_v29 = vsub.f32 %v707_v25, %v709_v26 }
  0x91   : > { %v712_v30 = vsub.f32 %v708_v27, %v710_v28 }
  0x92   : > { %742 = vperm.xlu0 %1882, %v706_v24   ;;  %761 = vperm.xlu1 %1883, %v711_v29  }
  0x96   : > { %766 = vperm.xlu1 %1883, %v712_v30  }
 0x109   : > { %v738_v47 = vpop.permute.xlu0 %737 }
 0x10a   : > { %v745_v56 = vmul.f32 %v738_v47, %v713_v45  ;;  %v746_v60 = vmul.f32 %v738_v47, %v714_v46  ;;  %v747_v61 = vmul.f32 %v738_v47, %v715_v48  ;;  %v748_v62 = vmul.f32 %v738_v47, %v716_v49 }
 0x10b   : > { %v749_v63 = vmul.f32 %v738_v47, %v717_v50  ;;  %v750_v3 = vmul.f32 %v738_v47, %v718_v53  ;;  %v751_v4 = vmul.f32 %v738_v47, %v719_v54 }
 0x10d   : > { %v743_v5 = vpop.permute.xlu0 %742  ;;  %v762_v6 = vpop.permute.xlu1 %761 }
 0x10e   : > { %v752_v8 = vmul.f32 %v743_v5, %v720_v57  ;;  %v753_v9 = vmul.f32 %v743_v5, %v721_v58  ;;  %v754_v10 = vmul.f32 %v743_v5, %v722_v59  ;;  %v755_v11 = vmul.f32 %v743_v5, %v723_v0 }
 0x10f   : > { %v756_v12 = vmul.f32 %v743_v5, %v724_v1  ;;  %v757_v13 = vmul.f32 %v743_v5, %v725_v2  ;;  %v769_v14 = vadd.f32 %v762_v6, %v745_v56  ;;  %v770_v15 = vadd.f32 %v762_v6, %v746_v60 }
 0x110   : > { %v771_v16 = vadd.f32 %v762_v6, %v747_v61  ;;  %v772_v17 = vadd.f32 %v762_v6, %v748_v62  ;;  %v773_v18 = vadd.f32 %v762_v6, %v749_v63  ;;  %v758_v19 = vmul.f32 %v743_v5, %v726_v7 }
 0x111   : > { %v774_v20 = vadd.f32 %v762_v6, %v750_v3  ;;  %v775_v21 = vadd.f32 %v762_v6, %v751_v4  ;;  %v767_v22 = vpop.permute.xlu1 %766  ;;  %v797_v23 = vsel %vm728_vm0, %v769_v14, 0.0  ;;  %v798_v31 = vsel %vm729_vm1, %v770_v15, 0.0 }
 0x112   : > { %v776_v24 = vadd.f32 %v767_v22, %v752_v8  ;;  %v777_v25 = vadd.f32 %v767_v22, %v753_v9  ;;  %v778_v26 = vadd.f32 %v767_v22, %v754_v10  ;;  %v779_v27 = vadd.f32 %v767_v22, %v755_v11  ;;  %811 = vst [vmem:[%s2430_s13] sm:$0xff] %v797_v23 }
 0x113   : > { %v780_v28 = vadd.f32 %v767_v22, %v756_v12  ;;  %v781_v29 = vadd.f32 %v767_v22, %v757_v13  ;;  %v782_v30 = vadd.f32 %v767_v22, %v758_v19  ;;  %v799_v32 = vsel %vm730_vm2, %v771_v16, 0.0  ;;  %812 = vst [vmem:[%s2430_s13 + $0x8] sm:$0xff] %v798_v31 }
 0x114   : > { %v800_v33 = vsel %vm731_vm3, %v772_v17, 0.0  ;;  %v801_v34 = vsel %vm732_vm4, %v773_v18, 0.0  ;;  %v802_v35 = vsel %vm733_vm5, %v774_v20, 0.0  ;;  %v803_v36 = vsel %vm734_vm6, %v775_v21, 0.0  ;;  %813 = vst [vmem:[%s2430_s13 + $0x10] sm:$0xff] %v799_v32 }
 0x115   : > { %v804_v37 = vsel %vm728_vm0, %v776_v24, 0.0  ;;  %v805_v38 = vsel %vm729_vm1, %v777_v25, 0.0  ;;  %v806_v39 = vsel %vm730_vm2, %v778_v26, 0.0  ;;  %814 = vst [vmem:[%s2430_s13 + $0x18] sm:$0xff] %v800_v33  ;;  %815 = vst [vmem:[%s2430_s13 + $0x20] sm:$0xff] %v801_v34  ;;  %v807_v40 = vsel %vm731_vm3, %v779_v27, 0.0 }
 0x116   : > { %816 = vst [vmem:[%s2430_s13 + $0x28] sm:$0xff] %v802_v35  ;;  %v808_v41 = vsel %vm732_vm4, %v780_v28, 0.0  ;;  %v809_v45 = vsel %vm733_vm5, %v781_v29, 0.0  ;;  %v810_v42 = vsel %vm734_vm6, %v782_v30, 0.0  ;;  %817 = vst [vmem:[%s2430_s13 + $0x30] sm:$0xff] %v803_v36  ;;  %831 = sbr.rel (!%p2274_p11) target bundleno = 405 (0x195), region = 110 }
 0x117   : > { %818 = vst [vmem:[%s2430_s13 + $0x38] sm:$0x3] %v804_v37  ;;  %819 = vst [vmem:[%s2430_s13 + $0x40] sm:$0x3] %v805_v38 }
 0x118   : > { %820 = vst [vmem:[%s2430_s13 + $0x48] sm:$0x3] %v806_v39  ;;  %821 = vst [vmem:[%s2430_s13 + $0x50] sm:$0x3] %v807_v40 }
 0x119   : > { %822 = vst [vmem:[%s2430_s13 + $0x58] sm:$0x3] %v808_v41  ;;  %823 = vst [vmem:[%s2430_s13 + $0x60] sm:$0x3] %v809_v45 }
 0x11a   : > { %824 = vst [vmem:[%s2430_s13 + $0x68] sm:$0x3] %v810_v42 }
 0x11b   : > { %s2880_s14 = smov (!%p834_p2, %s833_s14), 7 }
 0x11c   : > { %s1524_s21 = sshll.u32 %s2880_s14, 8  ;;  %s2494_s1 = sshll.u32 %s2880_s14, 3 }
 0x11d   : > { %p1529_p3 = scmp.eq.s32.totalorder %s1524_s21, 0 }
 0x11e   : > { %p846_p11 = scmp.lt.u32.totalorder (!%p1529_p3), %s2494_s1, 8 }
 0x11f   : > { %845 = sbr.rel (%p1529_p3) target bundleno = 405 (0x195), region = 114 }
 0x124   : > { %849 = sbr.rel (%p846_p11) target bundleno = 396 (0x18c), region = 118  ;;  %s2498_s28 = sand.u32 (!%p846_p11), 7, %s2494_s1  }
 0x125   : > { %p868_p4 = scmp.eq.s32.totalorder (!%p846_p11), %s2498_s28, 0  ;;  %p1530_p5 = scmp.ne.s32.totalorder (!%p846_p11), %s2498_s28, 0 }
 0x129   : > { %871 = sbr.rel (%p1530_p5) target bundleno = 344 (0x158), region = 133  ;;  %s872_s0 = sshrl.u32 (!%p1530_p5), %s2494_s1, 3 }
 0x12a   : > { %s2505_s12 = sshrl.u32 (!%p1530_p5), %s872_s0, 5 }
 0x12b   : > { %p1531_p6 = scmp.le.s32.totalorder (!%p1530_p5), %s2505_s12, 0 }
 0x12e   : > { %1408 = sbr.rel (%p1531_p6) target bundleno = 328 (0x148), region = 281  ;;  %s2850_s8 = smov (!%p1531_p6), %s2492_s20 }
 0x12f   : > { %s2851_s19 = smov (!%p1531_p6), %s2430_s13  ;;  %s2514_s30 = smov (!%p1531_p6), 0  }
 0x130   : > { %s2516_s9 = smov (!%p1531_p6), 0  }
 0x133 LB: >> { %v885_v43 = vld [vmem:[%s2124_s19] sm:$0xff]  ;;  %v887_v44 = vld [vmem:[%s2124_s19 + $0x8] sm:$0xff]  ;;  %v889_v46 = vld [vmem:[%s2124_s19 + $0x10] sm:$0xff]  ;;  %s1013_s25 = sadd.s32 1, %s2128_s30  ;;  %s879_s9 = sadd.s32 1, %s2132_s9   ;;  %s2132_s9 = sphi %s2516_s9, %s879_s9   ;;  %s2128_s30 = sphi %s2514_s30, %s2854_s30   ;;  %s2124_s19 = sphi %s2851_s19, %s2853_s19   ;;  %s2120_s8 = sphi %s2850_s8, %s2852_s8  }
 0x134   : >> { %886 = vst [vmem:[%s2120_s8] sm:$0xff] %v885_v43  ;;  %888 = vst [vmem:[%s2120_s8 + $0x8] sm:$0xff] %v887_v44  ;;  %v891_v47 = vld [vmem:[%s2124_s19 + $0x18] sm:$0xff]  ;;  %v893_v48 = vld [vmem:[%s2124_s19 + $0x20] sm:$0xff]  ;;  %p1014_p7 = scmp.ge.s32.totalorder %s1013_s25, %s2505_s12  ;;  %p878_p8 = scmp.ge.s32.totalorder %s879_s9, %s2505_s12 }
 0x135   : >> { %890 = vst [vmem:[%s2120_s8 + $0x10] sm:$0xff] %v889_v46  ;;  %v895_v49 = vld [vmem:[%s2124_s19 + $0x28] sm:$0xff]  ;;  %892 = vst [vmem:[%s2120_s8 + $0x18] sm:$0xff] %v891_v47  ;;  %v897_v50 = vld [vmem:[%s2124_s19 + $0x30] sm:$0xff] }
 0x136   : >> { %894 = vst [vmem:[%s2120_s8 + $0x20] sm:$0xff] %v893_v48  ;;  %896 = vst [vmem:[%s2120_s8 + $0x28] sm:$0xff] %v895_v49  ;;  %v899_v51 = vld [vmem:[%s2124_s19 + $0x38] sm:$0xff]  ;;  %v951_v52 = vld [vmem:[%s2124_s19 + $0x40] sm:$0xff]  ;;  %s2882_s25 = smov (%p1014_p7, %s1013_s25), 0 }
 0x137   : >> { %898 = vst [vmem:[%s2120_s8 + $0x30] sm:$0xff] %v897_v50  ;;  %900 = vst [vmem:[%s2120_s8 + $0x38] sm:$0xff] %v899_v51  ;;  %v953_v53 = vld [vmem:[%s2124_s19 + $0x48] sm:$0xff]  ;;  %v955_v54 = vld [vmem:[%s2124_s19 + $0x50] sm:$0xff]  ;;  %s1532_s15 = sshll.u32 %s2882_s25, 8  ;;  %s2854_s30 = smov %s2882_s25 }
 0x138   : >> { %950 = vst [vmem:[%s2120_s8 + $0x40] sm:$0xff] %v899_v51  ;;  %952 = vst [vmem:[%s2120_s8 + $0x48] sm:$0xff] %v951_v52  ;;  %v957_v55 = vld [vmem:[%s2124_s19 + $0x58] sm:$0xff]  ;;  %v959_v56 = vld [vmem:[%s2124_s19 + $0x60] sm:$0xff]  ;;  %s2588_s11 = scalar_lea.vmem %s2430_s13, %s1532_s15 [#allocation5]   ;;  %s2591_s26 = scalar_lea.vmem %s2492_s20, %s1532_s15  }
 0x139   : >> { %954 = vst [vmem:[%s2120_s8 + $0x50] sm:$0xff] %v953_v53  ;;  %956 = vst [vmem:[%s2120_s8 + $0x58] sm:$0xff] %v955_v54  ;;  %v961_v57 = vld [vmem:[%s2124_s19 + $0x68] sm:$0xff]  ;;  %v963_v58 = vld [vmem:[%s2124_s19 + $0x70] sm:$0xff] }
 0x13a   : >> { %958 = vst [vmem:[%s2120_s8 + $0x60] sm:$0xff] %v957_v55  ;;  %960 = vst [vmem:[%s2120_s8 + $0x68] sm:$0xff] %v959_v56  ;;  %v965_v59 = vld [vmem:[%s2124_s19 + $0x78] sm:$0xff]  ;;  %v967_v60 = vld [vmem:[%s2124_s19 + $0x80] sm:$0xff] }
 0x13b   : >> { %962 = vst [vmem:[%s2120_s8 + $0x70] sm:$0xff] %v961_v57  ;;  %964 = vst [vmem:[%s2120_s8 + $0x78] sm:$0xff] %v963_v58  ;;  %v969_v61 = vld [vmem:[%s2124_s19 + $0x88] sm:$0xff]  ;;  %v971_v62 = vld [vmem:[%s2124_s19 + $0x90] sm:$0xff] }
 0x13c   : >> { %966 = vst [vmem:[%s2120_s8 + $0x80] sm:$0xff] %v965_v59  ;;  %968 = vst [vmem:[%s2120_s8 + $0x88] sm:$0xff] %v967_v60  ;;  %v973_v63 = vld [vmem:[%s2124_s19 + $0x98] sm:$0xff]  ;;  %v975_v0 = vld [vmem:[%s2124_s19 + $0xa0] sm:$0xff] }
 0x13d   : >> { %970 = vst [vmem:[%s2120_s8 + $0x90] sm:$0xff] %v969_v61  ;;  %972 = vst [vmem:[%s2120_s8 + $0x98] sm:$0xff] %v971_v62  ;;  %v977_v1 = vld [vmem:[%s2124_s19 + $0xa8] sm:$0xff]  ;;  %v979_v2 = vld [vmem:[%s2124_s19 + $0xb0] sm:$0xff] }
 0x13e   : >> { %974 = vst [vmem:[%s2120_s8 + $0xa0] sm:$0xff] %v973_v63  ;;  %976 = vst [vmem:[%s2120_s8 + $0xa8] sm:$0xff] %v975_v0  ;;  %v981_v3 = vld [vmem:[%s2124_s19 + $0xb8] sm:$0xff]  ;;  %v983_v4 = vld [vmem:[%s2124_s19 + $0xc0] sm:$0xff] }
 0x13f   : >> { %978 = vst [vmem:[%s2120_s8 + $0xb0] sm:$0xff] %v977_v1  ;;  %980 = vst [vmem:[%s2120_s8 + $0xb8] sm:$0xff] %v979_v2  ;;  %v985_v5 = vld [vmem:[%s2124_s19 + $0xc8] sm:$0xff]  ;;  %v987_v6 = vld [vmem:[%s2124_s19 + $0xd0] sm:$0xff] }
 0x140   : >> { %982 = vst [vmem:[%s2120_s8 + $0xc0] sm:$0xff] %v981_v3  ;;  %984 = vst [vmem:[%s2120_s8 + $0xc8] sm:$0xff] %v983_v4  ;;  %v989_v7 = vld [vmem:[%s2124_s19 + $0xd8] sm:$0xff]  ;;  %v991_v8 = vld [vmem:[%s2124_s19 + $0xe0] sm:$0xff] }
 0x141   : >> { %986 = vst [vmem:[%s2120_s8 + $0xd0] sm:$0xff] %v985_v5  ;;  %988 = vst [vmem:[%s2120_s8 + $0xd8] sm:$0xff] %v987_v6  ;;  %v993_v9 = vld [vmem:[%s2124_s19 + $0xe8] sm:$0xff]  ;;  %v995_v10 = vld [vmem:[%s2124_s19 + $0xf0] sm:$0xff] }
 0x142   : >> { %990 = vst [vmem:[%s2120_s8 + $0xe0] sm:$0xff] %v989_v7  ;;  %992 = vst [vmem:[%s2120_s8 + $0xe8] sm:$0xff] %v991_v8  ;;  %v997_v11 = vld [vmem:[%s2124_s19 + $0xf8] sm:$0xff]  ;;  %v999_v12 = vld [vmem:[%s2124_s19 + $0x100] sm:$0xff] }
 0x143   : >> { %994 = vst [vmem:[%s2120_s8 + $0xf0] sm:$0xff] %v993_v9  ;;  %996 = vst [vmem:[%s2120_s8 + $0xf8] sm:$0xff] %v995_v10  ;;  %v1001_v13 = vld [vmem:[%s2124_s19 + $0x108] sm:$0xff]  ;;  %v1003_v14 = vld [vmem:[%s2124_s19 + $0x110] sm:$0xff]  ;;  %881 = sbr.rel (!%p878_p8) target bundleno = 307 (0x133), region = 287 }
 0x144   : >> { %998 = vst [vmem:[%s2120_s8 + $0x100] sm:$0xff] %v997_v11  ;;  %1000 = vst [vmem:[%s2120_s8 + $0x108] sm:$0xff] %v999_v12  ;;  %v1005_v15 = vld [vmem:[%s2124_s19 + $0x118] sm:$0xff]  ;;  %v1007_v16 = vld [vmem:[%s2124_s19 + $0x120] sm:$0xff] }
 0x145   : >> { %1002 = vst [vmem:[%s2120_s8 + $0x110] sm:$0xff] %v1001_v13  ;;  %1004 = vst [vmem:[%s2120_s8 + $0x118] sm:$0xff] %v1003_v14  ;;  %v1009_v17 = vld [vmem:[%s2124_s19 + $0x128] sm:$0xff]  ;;  %v1011_v18 = vld [vmem:[%s2124_s19 + $0x130] sm:$0xff]  ;;  %s2853_s19 = smov %s2588_s11 }
 0x146   : >> { %1006 = vst [vmem:[%s2120_s8 + $0x120] sm:$0xff] %v1005_v15  ;;  %1008 = vst [vmem:[%s2120_s8 + $0x128] sm:$0xff] %v1007_v16 }
 0x147   : >> { %1010 = vst [vmem:[%s2120_s8 + $0x130] sm:$0xff] %v1009_v17  ;;  %1012 = vst [vmem:[%s2120_s8 + $0x138] sm:$0xff] %v1011_v18  ;;  %s2852_s8 = smov %s2591_s26 }
 0x148 PF: > { %s2635_s24 = sand.u32 31, %s872_s0   ;;  %s1558_s10 = sshll.u32 %s2505_s12, 12 }
 0x149   : > { %s1024_s14 = sshra.s32 %s1558_s10, 4  ;;  %p1537_p9 = scmp.le.s32.totalorder %s2635_s24, 0 }
 0x14a   : > { %s2639_s22 = scalar_lea.vmem %s2430_s13, %s1024_s14 [#allocation5]   ;;  %s1028_s23 = scalar_lea.vmem %s2492_s20, %s1024_s14  }
 0x14b   : > { %1422 = sbr.rel (%p1537_p9) target bundleno = 344 (0x158), region = 292  ;;  %s2134_s17 = smov (!%p1537_p9), %s1028_s23  }
 0x14c   : > { %s2138_s18 = smov (!%p1537_p9), %s2639_s22   ;;  %s2142_s21 = smov (!%p1537_p9), 0  }
 0x14d   : > { %s2146_s8 = smov (!%p1537_p9), 0  }
 0x150 LB: >> { %v1040_v19 = vld [vmem:[%s2140_s18] sm:$0xff]  ;;  %v1042_v20 = vld [vmem:[%s2140_s18 + $0x38] sm:$0xff]  ;;  %s1044_s0 = sadd.s32 1, %s2144_s21  ;;  %s1034_s8 = sadd.s32 1, %s2148_s8   ;;  %s2148_s8 = sphi %s2146_s8, %s1034_s8   ;;  %s2144_s21 = sphi %s2142_s21, %s2143_s21   ;;  %s2140_s18 = sphi %s2138_s18, %s1049_s18   ;;  %s2136_s17 = sphi %s2134_s17, %s1050_s17  }
 0x151   : >> { %1041 = vst [vmem:[%s2136_s17] sm:$0xff] %v1040_v19  ;;  %1043 = vst [vmem:[%s2136_s17 + $0x40] sm:$0xff] %v1042_v20  ;;  %p1045_p10 = scmp.ge.s32.totalorder %s1044_s0, %s2635_s24  ;;  %p1033_p12 = scmp.ge.s32.totalorder %s1034_s8, %s2635_s24 }
 0x153   : >> { %s2884_s0 = smov (%p1045_p10, %s1044_s0), 0  ;;  %1036 = sbr.rel (!%p1033_p12) target bundleno = 336 (0x150), region = 298 }
 0x154   : >> { %s1538_s12 = sshll.u32 %s2884_s0, 3  ;;  %s2143_s21 = smov %s2884_s0  }
 0x155   : >> { %s1049_s18 = scalar_lea.vmem %s2639_s22, %s1538_s12 [#allocation5]   ;;  %s1050_s17 = scalar_lea.vmem %s1028_s23, %s1538_s12  }
 0x158 PF: > { %1053 = sbr.rel (%p868_p4) target bundleno = 396 (0x18c), region = 151  ;;  %s1055_s19 = ssub.s32 (!%p868_p4), %s2494_s1, %s2498_s28 }
 0x159   : > { %s1059_s30 = sshrl.u32 (!%p868_p4), %s2494_s1, 3  ;;  %s2653_s9 = scalar_lea.vmem (!%p868_p4), %s2430_s13, %s1055_s19 [#allocation5] }
 0x15a   : > { %s2656_s25 = scalar_lea.vmem (!%p868_p4), %s2492_s20, %s1055_s19  ;;  %s2660_s15 = sshrl.u32 (!%p868_p4), %s1059_s30, 5 }
 0x15b   : > { %p1540_p13 = scmp.le.s32.totalorder (!%p868_p4), %s2660_s15, 0 }
 0x15d   : > { %1436 = sbr.rel (%p1540_p13) target bundleno = 375 (0x177), region = 303  ;;  %s2855_s11 = smov (!%p1540_p13), %s2492_s20 }
 0x15e   : > { %s2856_s26 = smov (!%p1540_p13), %s2430_s13  ;;  %s2669_s24 = smov (!%p1540_p13), 0  }
 0x15f   : > { %s2671_s10 = smov (!%p1540_p13), 0  }
 0x162 LB: >> { %v1072_v21 = vld [vmem:[%s2156_s26] sm:$0xff]  ;;  %v1074_v22 = vld [vmem:[%s2156_s26 + $0x8] sm:$0xff]  ;;  %v1076_v23 = vld [vmem:[%s2156_s26 + $0x10] sm:$0xff]  ;;  %s1200_s14 = sadd.s32 1, %s2160_s24  ;;  %s1066_s10 = sadd.s32 1, %s2164_s10   ;;  %s2164_s10 = sphi %s2671_s10, %s1066_s10   ;;  %s2160_s24 = sphi %s2669_s24, %s2859_s24   ;;  %s2156_s26 = sphi %s2856_s26, %s2858_s26   ;;  %s2152_s11 = sphi %s2855_s11, %s2857_s11  }
 0x163   : >> { %1073 = vst [vmem:[%s2152_s11] sm:$0xff] %v1072_v21  ;;  %1075 = vst [vmem:[%s2152_s11 + $0x8] sm:$0xff] %v1074_v22  ;;  %v1078_v24 = vld [vmem:[%s2156_s26 + $0x18] sm:$0xff]  ;;  %v1080_v25 = vld [vmem:[%s2156_s26 + $0x20] sm:$0xff]  ;;  %p1201_p0 = scmp.ge.s32.totalorder %s1200_s14, %s2660_s15  ;;  %p1065_p1 = scmp.ge.s32.totalorder %s1066_s10, %s2660_s15 }
 0x164   : >> { %1077 = vst [vmem:[%s2152_s11 + $0x10] sm:$0xff] %v1076_v23  ;;  %v1082_v26 = vld [vmem:[%s2156_s26 + $0x28] sm:$0xff]  ;;  %1079 = vst [vmem:[%s2152_s11 + $0x18] sm:$0xff] %v1078_v24  ;;  %v1084_v27 = vld [vmem:[%s2156_s26 + $0x30] sm:$0xff] }
 0x165   : >> { %1081 = vst [vmem:[%s2152_s11 + $0x20] sm:$0xff] %v1080_v25  ;;  %1083 = vst [vmem:[%s2152_s11 + $0x28] sm:$0xff] %v1082_v26  ;;  %v1086_v28 = vld [vmem:[%s2156_s26 + $0x38] sm:$0xff]  ;;  %v1138_v29 = vld [vmem:[%s2156_s26 + $0x40] sm:$0xff]  ;;  %s2886_s14 = smov (%p1201_p0, %s1200_s14), 0 }
 0x166   : >> { %1085 = vst [vmem:[%s2152_s11 + $0x30] sm:$0xff] %v1084_v27  ;;  %1087 = vst [vmem:[%s2152_s11 + $0x38] sm:$0xff] %v1086_v28  ;;  %v1140_v30 = vld [vmem:[%s2156_s26 + $0x48] sm:$0xff]  ;;  %v1142_v31 = vld [vmem:[%s2156_s26 + $0x50] sm:$0xff]  ;;  %s1541_s22 = sshll.u32 %s2886_s14, 8  ;;  %s2859_s24 = smov %s2886_s14 }
 0x167   : >> { %1137 = vst [vmem:[%s2152_s11 + $0x40] sm:$0xff] %v1086_v28  ;;  %1139 = vst [vmem:[%s2152_s11 + $0x48] sm:$0xff] %v1138_v29  ;;  %v1144_v32 = vld [vmem:[%s2156_s26 + $0x58] sm:$0xff]  ;;  %v1146_v33 = vld [vmem:[%s2156_s26 + $0x60] sm:$0xff]  ;;  %s2743_s23 = scalar_lea.vmem %s2430_s13, %s1541_s22 [#allocation5]   ;;  %s2746_s17 = scalar_lea.vmem %s2492_s20, %s1541_s22  }
 0x168   : >> { %1141 = vst [vmem:[%s2152_s11 + $0x50] sm:$0xff] %v1140_v30  ;;  %1143 = vst [vmem:[%s2152_s11 + $0x58] sm:$0xff] %v1142_v31  ;;  %v1148_v34 = vld [vmem:[%s2156_s26 + $0x68] sm:$0xff]  ;;  %v1150_v35 = vld [vmem:[%s2156_s26 + $0x70] sm:$0xff] }
 0x169   : >> { %1145 = vst [vmem:[%s2152_s11 + $0x60] sm:$0xff] %v1144_v32  ;;  %1147 = vst [vmem:[%s2152_s11 + $0x68] sm:$0xff] %v1146_v33  ;;  %v1152_v36 = vld [vmem:[%s2156_s26 + $0x78] sm:$0xff]  ;;  %v1154_v37 = vld [vmem:[%s2156_s26 + $0x80] sm:$0xff] }
 0x16a   : >> { %1149 = vst [vmem:[%s2152_s11 + $0x70] sm:$0xff] %v1148_v34  ;;  %1151 = vst [vmem:[%s2152_s11 + $0x78] sm:$0xff] %v1150_v35  ;;  %v1156_v38 = vld [vmem:[%s2156_s26 + $0x88] sm:$0xff]  ;;  %v1158_v39 = vld [vmem:[%s2156_s26 + $0x90] sm:$0xff] }
 0x16b   : >> { %1153 = vst [vmem:[%s2152_s11 + $0x80] sm:$0xff] %v1152_v36  ;;  %1155 = vst [vmem:[%s2152_s11 + $0x88] sm:$0xff] %v1154_v37  ;;  %v1160_v40 = vld [vmem:[%s2156_s26 + $0x98] sm:$0xff]  ;;  %v1162_v41 = vld [vmem:[%s2156_s26 + $0xa0] sm:$0xff] }
 0x16c   : >> { %1157 = vst [vmem:[%s2152_s11 + $0x90] sm:$0xff] %v1156_v38  ;;  %1159 = vst [vmem:[%s2152_s11 + $0x98] sm:$0xff] %v1158_v39  ;;  %v1164_v45 = vld [vmem:[%s2156_s26 + $0xa8] sm:$0xff]  ;;  %v1166_v42 = vld [vmem:[%s2156_s26 + $0xb0] sm:$0xff] }
 0x16d   : >> { %1161 = vst [vmem:[%s2152_s11 + $0xa0] sm:$0xff] %v1160_v40  ;;  %1163 = vst [vmem:[%s2152_s11 + $0xa8] sm:$0xff] %v1162_v41  ;;  %v1168_v43 = vld [vmem:[%s2156_s26 + $0xb8] sm:$0xff]  ;;  %v1170_v44 = vld [vmem:[%s2156_s26 + $0xc0] sm:$0xff] }
 0x16e   : >> { %1165 = vst [vmem:[%s2152_s11 + $0xb0] sm:$0xff] %v1164_v45  ;;  %1167 = vst [vmem:[%s2152_s11 + $0xb8] sm:$0xff] %v1166_v42  ;;  %v1172_v46 = vld [vmem:[%s2156_s26 + $0xc8] sm:$0xff]  ;;  %v1174_v47 = vld [vmem:[%s2156_s26 + $0xd0] sm:$0xff] }
 0x16f   : >> { %1169 = vst [vmem:[%s2152_s11 + $0xc0] sm:$0xff] %v1168_v43  ;;  %1171 = vst [vmem:[%s2152_s11 + $0xc8] sm:$0xff] %v1170_v44  ;;  %v1176_v48 = vld [vmem:[%s2156_s26 + $0xd8] sm:$0xff]  ;;  %v1178_v49 = vld [vmem:[%s2156_s26 + $0xe0] sm:$0xff] }
 0x170   : >> { %1173 = vst [vmem:[%s2152_s11 + $0xd0] sm:$0xff] %v1172_v46  ;;  %1175 = vst [vmem:[%s2152_s11 + $0xd8] sm:$0xff] %v1174_v47  ;;  %v1180_v50 = vld [vmem:[%s2156_s26 + $0xe8] sm:$0xff]  ;;  %v1182_v51 = vld [vmem:[%s2156_s26 + $0xf0] sm:$0xff] }
 0x171   : >> { %1177 = vst [vmem:[%s2152_s11 + $0xe0] sm:$0xff] %v1176_v48  ;;  %1179 = vst [vmem:[%s2152_s11 + $0xe8] sm:$0xff] %v1178_v49  ;;  %v1184_v52 = vld [vmem:[%s2156_s26 + $0xf8] sm:$0xff]  ;;  %v1186_v53 = vld [vmem:[%s2156_s26 + $0x100] sm:$0xff] }
 0x172   : >> { %1181 = vst [vmem:[%s2152_s11 + $0xf0] sm:$0xff] %v1180_v50  ;;  %1183 = vst [vmem:[%s2152_s11 + $0xf8] sm:$0xff] %v1182_v51  ;;  %v1188_v54 = vld [vmem:[%s2156_s26 + $0x108] sm:$0xff]  ;;  %v1190_v55 = vld [vmem:[%s2156_s26 + $0x110] sm:$0xff]  ;;  %1068 = sbr.rel (!%p1065_p1) target bundleno = 354 (0x162), region = 309 }
 0x173   : >> { %1185 = vst [vmem:[%s2152_s11 + $0x100] sm:$0xff] %v1184_v52  ;;  %1187 = vst [vmem:[%s2152_s11 + $0x108] sm:$0xff] %v1186_v53  ;;  %v1192_v56 = vld [vmem:[%s2156_s26 + $0x118] sm:$0xff]  ;;  %v1194_v57 = vld [vmem:[%s2156_s26 + $0x120] sm:$0xff] }
 0x174   : >> { %1189 = vst [vmem:[%s2152_s11 + $0x110] sm:$0xff] %v1188_v54  ;;  %1191 = vst [vmem:[%s2152_s11 + $0x118] sm:$0xff] %v1190_v55  ;;  %v1196_v58 = vld [vmem:[%s2156_s26 + $0x128] sm:$0xff]  ;;  %v1198_v59 = vld [vmem:[%s2156_s26 + $0x130] sm:$0xff]  ;;  %s2858_s26 = smov %s2743_s23 }
 0x175   : >> { %1193 = vst [vmem:[%s2152_s11 + $0x120] sm:$0xff] %v1192_v56  ;;  %1195 = vst [vmem:[%s2152_s11 + $0x128] sm:$0xff] %v1194_v57 }
 0x176   : >> { %1197 = vst [vmem:[%s2152_s11 + $0x130] sm:$0xff] %v1196_v58  ;;  %1199 = vst [vmem:[%s2152_s11 + $0x138] sm:$0xff] %v1198_v59  ;;  %s2857_s11 = smov %s2746_s17 }
 0x177 PF: > { %s2790_s18 = sand.u32 31, %s1059_s30   ;;  %s1560_s21 = sshll.u32 %s2660_s15, 12 }
 0x178   : > { %s1211_s8 = sshra.s32 %s1560_s21, 4  ;;  %p1546_p2 = scmp.le.s32.totalorder %s2790_s18, 0 }
 0x179   : > { %s2794_s0 = scalar_lea.vmem %s2430_s13, %s1211_s8 [#allocation5]   ;;  %s1215_s12 = scalar_lea.vmem %s2492_s20, %s1211_s8  }
 0x17a   : > { %1450 = sbr.rel (%p1546_p2) target bundleno = 391 (0x187), region = 314  ;;  %s2166_s19 = smov (!%p1546_p2), %s1215_s12  }
 0x17b   : > { %s2170_s10 = smov (!%p1546_p2), %s2794_s0   ;;  %s2174_s14 = smov (!%p1546_p2), 0  }
 0x17c   : > { %s2178_s11 = smov (!%p1546_p2), 0  }
 0x17f LB: >> { %v1227_v60 = vld [vmem:[%s2172_s10] sm:$0xff]  ;;  %v1229_v61 = vld [vmem:[%s2172_s10 + $0x38] sm:$0xff]  ;;  %s1231_s30 = sadd.s32 1, %s2176_s14  ;;  %s1221_s11 = sadd.s32 1, %s2180_s11   ;;  %s2180_s11 = sphi %s2178_s11, %s1221_s11   ;;  %s2176_s14 = sphi %s2174_s14, %s2175_s14   ;;  %s2172_s10 = sphi %s2170_s10, %s1236_s10   ;;  %s2168_s19 = sphi %s2166_s19, %s1237_s19  }
 0x180   : >> { %1228 = vst [vmem:[%s2168_s19] sm:$0xff] %v1227_v60  ;;  %1230 = vst [vmem:[%s2168_s19 + $0x40] sm:$0xff] %v1229_v61  ;;  %p1232_p3 = scmp.ge.s32.totalorder %s1231_s30, %s2790_s18  ;;  %p1220_p11 = scmp.ge.s32.totalorder %s1221_s11, %s2790_s18 }
 0x182   : >> { %s2888_s30 = smov (%p1232_p3, %s1231_s30), 0  ;;  %1223 = sbr.rel (!%p1220_p11) target bundleno = 383 (0x17f), region = 320 }
 0x183   : >> { %s1547_s15 = sshll.u32 %s2888_s30, 3  ;;  %s2175_s14 = smov %s2888_s30  }
 0x184   : >> { %s1236_s10 = scalar_lea.vmem %s2794_s0, %s1547_s15 [#allocation5]   ;;  %s1237_s19 = scalar_lea.vmem %s1215_s12, %s1547_s15  }
 0x187 PF: > { %s2186_s26 = smov 1  }
 0x188   : > { %s1238_s24 = sshll.u32 %s2186_s26, %s2498_s28 }
 0x189   : > { %s1549_s22 = sadd.s32 4294967295, %s1238_s24 }
 0x18a   : > { %v1248_v62 = vld [vmem:[%s2653_s9] sm:%s1549_s22]  ;;  %v1250_v63 = vld [vmem:[%s2653_s9 + $0x38] sm:%s1549_s22] }
 0x18b   : > { %1249 = vst [vmem:[%s2656_s25] sm:%s1549_s22] %v1248_v62  ;;  %1251 = vst [vmem:[%s2656_s25 + $0x40] sm:%s1549_s22] %v1250_v63 }
 0x18c PF: > { %p1550_p4 = scmp.ge.u32.totalorder %s2494_s1, 8 }
 0x18d   : > { %s2187_s23 = smov (!%p1550_p4), 1  }
 0x18e   : > { %852 = sbr.rel (%p1550_p4) target bundleno = 405 (0x195), region = 122  ;;  %s853_s17 = sshll.u32 (!%p1550_p4), %s2187_s23, %s2494_s1 }
 0x18f   : > { %s1551_s18 = sadd.s32 (!%p1550_p4), 4294967295, %s853_s17 }
 0x193   : > { %v863_v0 = vld [vmem:[%s2430_s13] sm:%s1551_s18]  ;;  %v865_v1 = vld [vmem:[%s2430_s13 + $0x38] sm:%s1551_s18] }
 0x194   : > { %864 = vst [vmem:[%s2492_s20] sm:%s1551_s18] %v863_v0  ;;  %866 = vst [vmem:[%s2492_s20 + $0x40] sm:%s1551_s18] %v865_v1 }
 0x195 PF: > { %s22_s7 = sadd.s32 1, %s2084_s7   ;;  %s2860_s0 = sld [smem:[#allocation7_spill]] }
 0x196   : > { %p19_p5 = scmp.ge.s32.totalorder %s22_s7, 8   ;;  %s2861_s9 = sld [smem:[#allocation8_spill]] }
 0x197   : > { %s2862_s30 = sld [smem:[#allocation9_spill]]  ;;  %s2863_s26 = smov %s2064_s27 }
 0x198   : > { %s2864_s27 = smov %s2282_s16  ;;  %s2865_s28 = smov %s2076_s29 }
 0x199   :  { %21 = sbr.rel (!%p19_p5) target bundleno = 19 (0x13), region = 331 }
 0x19c   : > { %s2866_s29 = smov %s2861_s9 }

</bundles_post_ra>
